<compile_context>
chip_gen: v5e
topology: v5e:2x2
jax: 0.10.0
libtpu: 0.0.40
codegen_flags: <defaults>
</compile_context>

<pallas_src>
import jax
import jax.numpy as jnp
from jax import lax
from jax.experimental import pallas as pl
from jax.experimental.pallas import tpu as pltpu


def _round_up(x, m):
    return (x + m - 1) // m * m


def _make_dwsep_kernel(H, W, Cin, Ct, num_j, compute_dtype):
    """Builds the fused depthwise-3x3 + pointwise-1x1 + BN + ReLU kernel.

    Cin is the lane-padded input-channel count, Ct the Cout tile width and
    num_j the number of Cout tiles (static).
    """
    f32 = jnp.float32
    HW = H * W

    def depthwise(x_ref, dw_ref, xpad_ref):
        # H-only halo, kept flattened as ((H+2)*W, Cin): zero just the two
        # halo row-blocks and copy the interior.  All offsets are multiples of
        # W (W % 8 == 0 here), so every store/load is sublane aligned.
        zero_rows = jnp.zeros((W, Cin), dtype=xpad_ref.dtype)
        xpad_ref[0:W] = zero_rows
        xpad_ref[(H + 1) * W:(H + 2) * W] = zero_rows
        xpad_ref[W:(H + 1) * W] = x_ref[0].reshape(HW, Cin).astype(xpad_ref.dtype)

        # Column-validity masks for the +-1 column shifts (built once; the
        # wrapped roll positions are exactly the masked, out-of-image ones).
        col = lax.broadcasted_iota(jnp.int32, (W, Cin), 0)
        col = jnp.broadcast_to(col[None], (H, W, Cin)).reshape(HW, Cin)
        left_ok = col >= 1           # x[h, w-1] exists
        right_ok = col <= W - 2      # x[h, w+1] exists

        acc = None
        for kh in range(3):
            # Rows x[h + kh - 1, :, :], flattened; offset kh*W is aligned.
            rows = xpad_ref[kh * W:kh * W + HW].astype(f32)
            w_left = dw_ref[kh * 3 + 0].astype(f32)
            w_cent = dw_ref[kh * 3 + 1].astype(f32)
            w_right = dw_ref[kh * 3 + 2].astype(f32)
            # +-1 column shift == +-1 sublane roll of the flattened rows (XLU),
            # then mask the wrapped columns to reproduce the zero padding.
            left = jnp.where(left_ok, pltpu.roll(rows, shift=1, axis=0), 0.0)
            right = jnp.where(right_ok, pltpu.roll(rows, shift=HW - 1, axis=0), 0.0)
            term = rows * w_cent + left * w_left + right * w_right
            acc = term if acc is None else acc + term      # seeded, no zero pass
        return acc.astype(compute_dtype)                    # (HW, Cin)

    def pointwise(acc_c, pw_ref, bias_ref, o_ref, j):
        # Pointwise 1x1 conv as an (HW, Cin) x (Cin, Ct) MXU matmul; the BN
        # scale is pre-folded into pw, only the bias add + ReLU remain.
        pw_blk = pw_ref[j]                                   # (Cin, Ct), resident
        z = jnp.dot(acc_c, pw_blk, preferred_element_type=f32)
        z = jnp.maximum(z + bias_ref[j], 0.0)
        o_ref[...] = z.reshape(1, H, W, Ct).astype(o_ref.dtype)

    if num_j == 1:
        def kernel(x_ref, dw_ref, pw_ref, bias_ref, o_ref, xpad_ref):
            pointwise(depthwise(x_ref, dw_ref, xpad_ref), pw_ref, bias_ref, o_ref, 0)
        return kernel

    def kernel(x_ref, dw_ref, pw_ref, bias_ref, o_ref, xpad_ref, acc_ref):
        j = pl.program_id(1)

        # Depthwise result is independent of the Cout tile: compute once per
        # image (j == 0), feed the live value straight to the MXU and stash it
        # for the remaining tiles.  NOTE: relies on the grid iterating
        # n-major / j-minor and on j staying "arbitrary" (never "parallel").
        @pl.when(j == 0)
        def _():
            acc_c = depthwise(x_ref, dw_ref, xpad_ref)
            acc_ref[...] = acc_c
            pointwise(acc_c, pw_ref, bias_ref, o_ref, j)

        @pl.when(j > 0)
        def _():
            pointwise(acc_ref[...], pw_ref, bias_ref, o_ref, j)

    return kernel


def depthwise_separable_conv(x_nchw, dw_weight, pw_weight,
                             gamma, beta, running_mean, running_var,
                             eps=1e-5, stride=1,
                             compute_dtype=jnp.float32, cout_tile=None):
    """Fused depthwise-3x3(pad=1) + pointwise-1x1 + BN(eval) + ReLU.

    x_nchw: (N, Cin, H, W); dw_weight: (Cin, 1, 3, 3); pw_weight: (Cout, Cin, 1, 1).
    compute_dtype=jnp.bfloat16 halves HBM/VMEM bytes and uses the bf16 MXU on
    v6e/v7x; tap math and matmul accumulation stay float32.  On v5e prefer
    compute_dtype=float32 and cout_tile=128.
    """
    assert stride == 1, "only stride=1 is implemented"  # TODO(synk): stride > 1
    N, Cin, H, W = x_nchw.shape
    Cout = pw_weight.shape[0]

    Cin_p = _round_up(Cin, 128)
    c128 = _round_up(Cout, 128)
    if cout_tile is None:
        # v6e/v7x MXU is 2x256x256 -> prefer 256-wide output tiles when they
        # divide the padded Cout; otherwise 128 (also matches v5e's 4x128^2).
        cout_tile = 256 if (c128 >= 256 and c128 % 256 == 0) else 128
    Cout_p = _round_up(Cout, cout_tile)
    num_j = Cout_p // cout_tile

    # NCHW -> NHWC + channel pad (lane-dense input and output).
    x = jnp.transpose(x_nchw, (0, 2, 3, 1))
    x = jnp.pad(x, ((0, 0), (0, 0), (0, 0), (0, Cin_p - Cin))).astype(compute_dtype)

    # Depthwise weights: (Cin, 1, 3, 3) -> (9, Cin_p), row index = kh*3 + kw.
    dw = jnp.transpose(dw_weight[:, 0], (1, 2, 0)).reshape(9, Cin)
    dw = jnp.pad(dw, ((0, 0), (0, Cin_p - Cin))).astype(compute_dtype)

    # Fold BN scale into the pointwise weights; only the bias add stays fused.
    f32 = jnp.float32
    inv_std = lax.rsqrt(running_var.astype(f32) + eps)
    scale = gamma.astype(f32) * inv_std                           # (Cout,)
    bias = beta.astype(f32) - running_mean.astype(f32) * scale    # (Cout,)
    pw = jnp.transpose(pw_weight[:, :, 0, 0], (1, 0)).astype(f32) * scale[None, :]
    pw = jnp.pad(pw, ((0, Cin_p - Cin), (0, Cout_p - Cout))).astype(compute_dtype)
    # (Cin_p, Cout_p) -> (num_j, Cin_p, cout_tile): the whole weight stays
    # resident in VMEM (constant index_map); the kernel selects tile j with a
    # cheap outer-dim index, so pw/bias are DMA'd once, not N*num_j times.
    pw = pw.reshape(Cin_p, num_j, cout_tile).transpose(1, 0, 2)
    bias = jnp.pad(bias, (0, Cout_p - Cout)).reshape(num_j, 1, cout_tile)  # f32

    kernel = _make_dwsep_kernel(H, W, Cin_p, cout_tile, num_j, compute_dtype)

    scratch_shapes = [pltpu.VMEM(((H + 2) * W, Cin_p), compute_dtype)]  # H-halo rows
    if num_j > 1:
        scratch_shapes.append(pltpu.VMEM((H * W, Cin_p), compute_dtype))  # dw result

    out_nhwc = pl.pallas_call(
        kernel,
        out_shape=jax.ShapeDtypeStruct((N, H, W, Cout_p), compute_dtype),
        grid_spec=pltpu.PrefetchScalarGridSpec(
            num_scalar_prefetch=0,
            grid=(N, num_j),
            in_specs=[
                pl.BlockSpec((1, H, W, Cin_p), lambda n, j: (n, 0, 0, 0)),
                pl.BlockSpec((9, Cin_p), lambda n, j: (0, 0)),
                pl.BlockSpec((num_j, Cin_p, cout_tile), lambda n, j: (0, 0, 0)),
                pl.BlockSpec((num_j, 1, cout_tile), lambda n, j: (0, 0, 0)),
            ],
            out_specs=pl.BlockSpec((1, H, W, cout_tile),
                                   lambda n, j: (n, 0, 0, j)),
            scratch_shapes=scratch_shapes,
        ),
        compiler_params=pltpu.CompilerParams(
            # n can split across TensorCores; j must stay in-order ("arbitrary")
            # because the per-image depthwise scratch is reused across j.
            dimension_semantics=("parallel", "arbitrary")),
    )(x, dw, pw, bias)

    # Drop channel padding, NHWC -> NCHW to match the PyTorch output layout.
    return jnp.transpose(out_nhwc[..., :Cout], (0, 3, 1, 2))


def _reference(x_nchw, dw_weight, pw_weight, gamma, beta, mean, var, eps=1e-5):
    """Plain-JAX reference (eval-mode BN), NCHW throughout, float32."""
    dn = lax.conv_dimension_numbers(x_nchw.shape, dw_weight.shape,
                                    ("NCHW", "OIHW", "NCHW"))
    y = lax.conv_general_dilated(
        x_nchw, dw_weight, window_strides=(1, 1), padding=((1, 1), (1, 1)),
        dimension_numbers=dn, feature_group_count=x_nchw.shape[1])
    dn2 = lax.conv_dimension_numbers(y.shape, pw_weight.shape,
                                     ("NCHW", "OIHW", "NCHW"))
    y = lax.conv_general_dilated(y, pw_weight, window_strides=(1, 1),
                                 padding="VALID", dimension_numbers=dn2)
    scale = (gamma / jnp.sqrt(var + eps))[None, :, None, None]
    bias = (beta - mean * gamma / jnp.sqrt(var + eps))[None, :, None, None]
    return jnp.maximum(y * scale + bias, 0.0)


if __name__ == "__main__":
    key = jax.random.PRNGKey(0)
    k_x, k_dw, k_pw, k_g, k_b, k_m, k_v = jax.random.split(key, 7)

    N, Cin, H, W = 2, 4, 16, 16
    Cout = 8

    x = jax.random.normal(k_x, (N, Cin, H, W), jnp.float32)
    dw_weight = jax.random.normal(k_dw, (Cin, 1, 3, 3), jnp.float32) * 0.2
    pw_weight = jax.random.normal(k_pw, (Cout, Cin, 1, 1), jnp.float32) * 0.2
    gamma = 1.0 + 0.1 * jax.random.normal(k_g, (Cout,), jnp.float32)
    beta = 0.1 * jax.random.normal(k_b, (Cout,), jnp.float32)
    running_mean = 0.1 * jax.random.normal(k_m, (Cout,), jnp.float32)
    running_var = jnp.abs(1.0 + 0.1 * jax.random.normal(k_v, (Cout,), jnp.float32))

    ref = _reference(x, dw_weight, pw_weight, gamma, beta,
                     running_mean, running_var)

    # 1) float32, single Cout tile (num_j == 1): strict check vs lax reference.
    out = depthwise_separable_conv(x, dw_weight, pw_weight, gamma, beta,
                                   running_mean, running_var,
                                   compute_dtype=jnp.float32)
    out = jax.block_until_ready(out)
    assert out.shape == (N, Cout, H, W)
    assert jnp.allclose(out, ref, atol=1e-4, rtol=1e-4), "f32 mismatch vs reference"

    # 2) float32, multi-Cout-tile path (num_j > 1): exercises the depthwise
    #    reuse across j, resident pw tiles and padded-Cout output slicing.
    Cout2 = 160
    pw_weight2 = jax.random.normal(k_pw, (Cout2, Cin, 1, 1), jnp.float32) * 0.2
    gamma2 = jnp.ones((Cout2,), jnp.float32)
    beta2 = jnp.zeros((Cout2,), jnp.float32)
    mean2 = jnp.zeros((Cout2,), jnp.float32)
    var2 = jnp.ones((Cout2,), jnp.float32)
    ref2 = _reference(x, dw_weight, pw_weight2, gamma2, beta2, mean2, var2)
    out2 = depthwise_separable_conv(x, dw_weight, pw_weight2, gamma2, beta2,
                                    mean2, var2, compute_dtype=jnp.float32,
                                    cout_tile=128)
    out2 = jax.block_until_ready(out2)
    assert out2.shape == (N, Cout2, H, W)
    assert jnp.allclose(out2, ref2, atol=1e-4, rtol=1e-4), "multi-tile mismatch"

    # 3) bfloat16 storage / MXU path (v6e/v7x): f32 accumulation, loose tol.
    out_bf16 = depthwise_separable_conv(x, dw_weight, pw_weight, gamma, beta,
                                        running_mean, running_var,
                                        compute_dtype=jnp.bfloat16)
    out_bf16 = jax.block_until_ready(out_bf16)
    assert jnp.allclose(out_bf16.astype(jnp.float32), ref,
                        atol=5e-2, rtol=5e-2), "bf16 mismatch vs reference"

    print("KERNEL_OK")
</pallas_src>

<mosaic_0001>
module attributes {stable_mosaic.version = 11 : i64} {
  func.func @kernel(%arg0: i32, %arg1: i32, %arg2: memref<1x16x16x128xf32, #tpu.memory_space<vmem>>, %arg3: memref<9x128xf32, #tpu.memory_space<vmem>>, %arg4: memref<1x128x128xf32, #tpu.memory_space<vmem>>, %arg5: memref<1x1x128xf32, #tpu.memory_space<vmem>>, %arg6: memref<1x16x16x128xf32, #tpu.memory_space<vmem>>, %arg7: memref<288x128xf32, #tpu.memory_space<vmem>>) attributes {dimension_semantics = [#tpu.dimension_semantics<parallel>, #tpu.dimension_semantics<arbitrary>], iteration_bounds = array<i64: 2, 1>, scalar_prefetch = 0 : i64, scratch_operands = 1 : i64, tpu.core_type = #tpu.core_type<tc>, window_params = [{transform_indices = @transform_0, window_bounds = array<i64: 1, 16, 16, 128>}, {pipeline_mode = #tpu.pipeline_mode<synchronous>, transform_indices = @transform_1, window_bounds = array<i64: 9, 128>}, {pipeline_mode = #tpu.pipeline_mode<synchronous>, transform_indices = @transform_2, window_bounds = array<i64: 1, 128, 128>}, {pipeline_mode = #tpu.pipeline_mode<synchronous>, transform_indices = @transform_3, window_bounds = array<i64: 1, 1, 128>}, {transform_indices = @transform_4, window_bounds = array<i64: 1, 16, 16, 128>}]} {
    %cst = arith.constant 0.000000e+00 : f32
    %0 = vector.broadcast %cst : f32 to vector<16x128xf32>
    %c0 = arith.constant 0 : index
    %c0_0 = arith.constant 0 : index
    %1 = vector.load %arg7[%c0, %c0_0] : memref<288x128xf32, #tpu.memory_space<vmem>>, vector<16x128xf32>
    tpu.vector_store %arg7[%c0, %c0_0], %0 {strides = array<i32>} : memref<288x128xf32, #tpu.memory_space<vmem>>, vector<16x128xf32>,
    %c272 = arith.constant 272 : index
    %c0_1 = arith.constant 0 : index
    %2 = vector.load %arg7[%c272, %c0_1] : memref<288x128xf32, #tpu.memory_space<vmem>>, vector<16x128xf32>
    tpu.vector_store %arg7[%c272, %c0_1], %0 {strides = array<i32>} : memref<288x128xf32, #tpu.memory_space<vmem>>, vector<16x128xf32>,
    %c0_2 = arith.constant 0 : index
    %c0_3 = arith.constant 0 : index
    %c0_4 = arith.constant 0 : index
    %c0_5 = arith.constant 0 : index
    %3 = vector.load %arg2[%c0_2, %c0_3, %c0_4, %c0_5] : memref<1x16x16x128xf32, #tpu.memory_space<vmem>>, vector<1x16x16x128xf32>
    %4 = vector.shape_cast %3 : vector<1x16x16x128xf32> to vector<16x16x128xf32>
    %5 = vector.shape_cast %4 : vector<16x16x128xf32> to vector<256x128xf32>
    %c16 = arith.constant 16 : index
    %c0_6 = arith.constant 0 : index
    %6 = vector.load %arg7[%c16, %c0_6] : memref<288x128xf32, #tpu.memory_space<vmem>>, vector<256x128xf32>
    tpu.vector_store %arg7[%c16, %c0_6], %5 {strides = array<i32>} : memref<288x128xf32, #tpu.memory_space<vmem>>, vector<256x128xf32>,
    %7 = tpu.iota {dimensions = array<i32: 0>} : vector<16x128xi32>
    %8 = vector.shape_cast %7 : vector<16x128xi32> to vector<1x16x128xi32>
    %9 = vector.shape_cast %8 : vector<1x16x128xi32> to vector<1x16x128xi32>
    %10 = vector.broadcast %9 : vector<1x16x128xi32> to vector<16x16x128xi32>
    %11 = vector.shape_cast %10 : vector<16x16x128xi32> to vector<256x128xi32>
    %c1_i32 = arith.constant 1 : i32
    %12 = vector.broadcast %c1_i32 : i32 to vector<256x128xi32>
    %13 = arith.cmpi sge, %11, %12 : vector<256x128xi32>
    %c14_i32 = arith.constant 14 : i32
    %14 = vector.broadcast %c14_i32 : i32 to vector<256x128xi32>
    %15 = arith.cmpi sle, %11, %14 : vector<256x128xi32>
    %c0_7 = arith.constant 0 : index
    %c0_8 = arith.constant 0 : index
    %16 = vector.load %arg7[%c0_7, %c0_8] : memref<288x128xf32, #tpu.memory_space<vmem>>, vector<256x128xf32>
    %c0_9 = arith.constant 0 : index
    %c0_10 = arith.constant 0 : index
    %17 = vector.load %arg3[%c0_9, %c0_10] : memref<9x128xf32, #tpu.memory_space<vmem>>, vector<1x128xf32>
    %18 = vector.shape_cast %17 : vector<1x128xf32> to vector<128xf32>
    %c1 = arith.constant 1 : index
    %c0_11 = arith.constant 0 : index
    %19 = vector.load %arg3[%c1, %c0_11] : memref<9x128xf32, #tpu.memory_space<vmem>>, vector<1x128xf32>
    %20 = vector.shape_cast %19 : vector<1x128xf32> to vector<128xf32>
    %c2 = arith.constant 2 : index
    %c0_12 = arith.constant 0 : index
    %21 = vector.load %arg3[%c2, %c0_12] : memref<9x128xf32, #tpu.memory_space<vmem>>, vector<1x128xf32>
    %22 = vector.shape_cast %21 : vector<1x128xf32> to vector<128xf32>
    %c1_i32_13 = arith.constant 1 : i32
    %23 = tpu.dynamic_rotate %16 by %c1_i32_13 dim 0 : vector<256x128xf32>, i32 -> vector<256x128xf32>
    %cst_14 = arith.constant 0.000000e+00 : f32
    %24 = vector.broadcast %cst_14 : f32 to vector<256x128xf32>
    %25 = arith.select %13, %23, %24 : vector<256x128xi1>, vector<256x128xf32>
    %c255_i32 = arith.constant 255 : i32
    %26 = tpu.dynamic_rotate %16 by %c255_i32 dim 0 : vector<256x128xf32>, i32 -> vector<256x128xf32>
    %cst_15 = arith.constant 0.000000e+00 : f32
    %27 = vector.broadcast %cst_15 : f32 to vector<256x128xf32>
    %28 = arith.select %15, %26, %27 : vector<256x128xi1>, vector<256x128xf32>
    %29 = vector.shape_cast %20 : vector<128xf32> to vector<1x128xf32>
    %30 = vector.broadcast %29 : vector<1x128xf32> to vector<256x128xf32>
    %31 = arith.mulf %16, %30 : vector<256x128xf32>
    %32 = vector.shape_cast %18 : vector<128xf32> to vector<1x128xf32>
    %33 = vector.broadcast %32 : vector<1x128xf32> to vector<256x128xf32>
    %34 = arith.mulf %25, %33 : vector<256x128xf32>
    %35 = arith.addf %31, %34 : vector<256x128xf32>
    %36 = vector.shape_cast %22 : vector<128xf32> to vector<1x128xf32>
    %37 = vector.broadcast %36 : vector<1x128xf32> to vector<256x128xf32>
    %38 = arith.mulf %28, %37 : vector<256x128xf32>
    %39 = arith.addf %35, %38 : vector<256x128xf32>
    %c16_16 = arith.constant 16 : index
    %c0_17 = arith.constant 0 : index
    %40 = vector.load %arg7[%c16_16, %c0_17] : memref<288x128xf32, #tpu.memory_space<vmem>>, vector<256x128xf32>
    %c3 = arith.constant 3 : index
    %c0_18 = arith.constant 0 : index
    %41 = vector.load %arg3[%c3, %c0_18] : memref<9x128xf32, #tpu.memory_space<vmem>>, vector<1x128xf32>
    %42 = vector.shape_cast %41 : vector<1x128xf32> to vector<128xf32>
    %c4 = arith.constant 4 : index
    %c0_19 = arith.constant 0 : index
    %43 = vector.load %arg3[%c4, %c0_19] : memref<9x128xf32, #tpu.memory_space<vmem>>, vector<1x128xf32>
    %44 = vector.shape_cast %43 : vector<1x128xf32> to vector<128xf32>
    %c5 = arith.constant 5 : index
    %c0_20 = arith.constant 0 : index
    %45 = vector.load %arg3[%c5, %c0_20] : memref<9x128xf32, #tpu.memory_space<vmem>>, vector<1x128xf32>
    %46 = vector.shape_cast %45 : vector<1x128xf32> to vector<128xf32>
    %c1_i32_21 = arith.constant 1 : i32
    %47 = tpu.dynamic_rotate %40 by %c1_i32_21 dim 0 : vector<256x128xf32>, i32 -> vector<256x128xf32>
    %cst_22 = arith.constant 0.000000e+00 : f32
    %48 = vector.broadcast %cst_22 : f32 to vector<256x128xf32>
    %49 = arith.select %13, %47, %48 : vector<256x128xi1>, vector<256x128xf32>
    %c255_i32_23 = arith.constant 255 : i32
    %50 = tpu.dynamic_rotate %40 by %c255_i32_23 dim 0 : vector<256x128xf32>, i32 -> vector<256x128xf32>
    %cst_24 = arith.constant 0.000000e+00 : f32
    %51 = vector.broadcast %cst_24 : f32 to vector<256x128xf32>
    %52 = arith.select %15, %50, %51 : vector<256x128xi1>, vector<256x128xf32>
    %53 = vector.shape_cast %44 : vector<128xf32> to vector<1x128xf32>
    %54 = vector.broadcast %53 : vector<1x128xf32> to vector<256x128xf32>
    %55 = arith.mulf %40, %54 : vector<256x128xf32>
    %56 = vector.shape_cast %42 : vector<128xf32> to vector<1x128xf32>
    %57 = vector.broadcast %56 : vector<1x128xf32> to vector<256x128xf32>
    %58 = arith.mulf %49, %57 : vector<256x128xf32>
    %59 = arith.addf %55, %58 : vector<256x128xf32>
    %60 = vector.shape_cast %46 : vector<128xf32> to vector<1x128xf32>
    %61 = vector.broadcast %60 : vector<1x128xf32> to vector<256x128xf32>
    %62 = arith.mulf %52, %61 : vector<256x128xf32>
    %63 = arith.addf %59, %62 : vector<256x128xf32>
    %64 = arith.addf %39, %63 : vector<256x128xf32>
    %c32 = arith.constant 32 : index
    %c0_25 = arith.constant 0 : index
    %65 = vector.load %arg7[%c32, %c0_25] : memref<288x128xf32, #tpu.memory_space<vmem>>, vector<256x128xf32>
    %c6 = arith.constant 6 : index
    %c0_26 = arith.constant 0 : index
    %66 = vector.load %arg3[%c6, %c0_26] : memref<9x128xf32, #tpu.memory_space<vmem>>, vector<1x128xf32>
    %67 = vector.shape_cast %66 : vector<1x128xf32> to vector<128xf32>
    %c7 = arith.constant 7 : index
    %c0_27 = arith.constant 0 : index
    %68 = vector.load %arg3[%c7, %c0_27] : memref<9x128xf32, #tpu.memory_space<vmem>>, vector<1x128xf32>
    %69 = vector.shape_cast %68 : vector<1x128xf32> to vector<128xf32>
    %c8 = arith.constant 8 : index
    %c0_28 = arith.constant 0 : index
    %70 = vector.load %arg3[%c8, %c0_28] : memref<9x128xf32, #tpu.memory_space<vmem>>, vector<1x128xf32>
    %71 = vector.shape_cast %70 : vector<1x128xf32> to vector<128xf32>
    %c1_i32_29 = arith.constant 1 : i32
    %72 = tpu.dynamic_rotate %65 by %c1_i32_29 dim 0 : vector<256x128xf32>, i32 -> vector<256x128xf32>
    %cst_30 = arith.constant 0.000000e+00 : f32
    %73 = vector.broadcast %cst_30 : f32 to vector<256x128xf32>
    %74 = arith.select %13, %72, %73 : vector<256x128xi1>, vector<256x128xf32>
    %c255_i32_31 = arith.constant 255 : i32
    %75 = tpu.dynamic_rotate %65 by %c255_i32_31 dim 0 : vector<256x128xf32>, i32 -> vector<256x128xf32>
    %cst_32 = arith.constant 0.000000e+00 : f32
    %76 = vector.broadcast %cst_32 : f32 to vector<256x128xf32>
    %77 = arith.select %15, %75, %76 : vector<256x128xi1>, vector<256x128xf32>
    %78 = vector.shape_cast %69 : vector<128xf32> to vector<1x128xf32>
    %79 = vector.broadcast %78 : vector<1x128xf32> to vector<256x128xf32>
    %80 = arith.mulf %65, %79 : vector<256x128xf32>
    %81 = vector.shape_cast %67 : vector<128xf32> to vector<1x128xf32>
    %82 = vector.broadcast %81 : vector<1x128xf32> to vector<256x128xf32>
    %83 = arith.mulf %74, %82 : vector<256x128xf32>
    %84 = arith.addf %80, %83 : vector<256x128xf32>
    %85 = vector.shape_cast %71 : vector<128xf32> to vector<1x128xf32>
    %86 = vector.broadcast %85 : vector<1x128xf32> to vector<256x128xf32>
    %87 = arith.mulf %77, %86 : vector<256x128xf32>
    %88 = arith.addf %84, %87 : vector<256x128xf32>
    %89 = arith.addf %64, %88 : vector<256x128xf32>
    %c0_33 = arith.constant 0 : index
    %c0_34 = arith.constant 0 : index
    %c0_35 = arith.constant 0 : index
    %90 = vector.load %arg4[%c0_33, %c0_34, %c0_35] : memref<1x128x128xf32, #tpu.memory_space<vmem>>, vector<1x128x128xf32>
    %91 = vector.shape_cast %90 : vector<1x128x128xf32> to vector<128x128xf32>
    %cst_36 = arith.constant dense<0.000000e+00> : vector<256x128xf32>
    %92 = tpu.matmul %89, %91, %cst_36 {dimension_numbers = #tpu.dot_dimension_numbers<[1], [0], [0], [1], [0, 0, 1, 1], [], []>} : vector<256x128xf32>, vector<128x128xf32>, vector<256x128xf32> -> vector<256x128xf32>
    %c0_37 = arith.constant 0 : index
    %c0_38 = arith.constant 0 : index
    %c0_39 = arith.constant 0 : index
    %93 = vector.load %arg5[%c0_37, %c0_38, %c0_39] : memref<1x1x128xf32, #tpu.memory_space<vmem>>, vector<1x1x128xf32>
    %94 = vector.shape_cast %93 : vector<1x1x128xf32> to vector<1x128xf32>
    %95 = vector.broadcast %94 : vector<1x128xf32> to vector<256x128xf32>
    %96 = arith.addf %92, %95 : vector<256x128xf32>
    %cst_40 = arith.constant 0.000000e+00 : f32
    %97 = vector.broadcast %cst_40 : f32 to vector<256x128xf32>
    %98 = arith.maximumf %96, %97 : vector<256x128xf32>
    %99 = vector.shape_cast %98 : vector<256x128xf32> to vector<1x16x16x128xf32>
    %c0_41 = arith.constant 0 : index
    %c0_42 = arith.constant 0 : index
    %c0_43 = arith.constant 0 : index
    %c0_44 = arith.constant 0 : index
    %100 = vector.load %arg6[%c0_41, %c0_42, %c0_43, %c0_44] : memref<1x16x16x128xf32, #tpu.memory_space<vmem>>, vector<1x16x16x128xf32>
    tpu.vector_store %arg6[%c0_41, %c0_42, %c0_43, %c0_44], %99 {strides = array<i32>} : memref<1x16x16x128xf32, #tpu.memory_space<vmem>>, vector<1x16x16x128xf32>,
    return
  }
  func.func @transform_0(%arg0: i32, %arg1: i32) -> (i32, i32, i32, i32) {
    %c0_i32 = arith.constant 0 : i32
    %c0_i32_0 = arith.constant 0 : i32
    %c0_i32_1 = arith.constant 0 : i32
    %c0_i32_2 = arith.constant 0 : i32
    return %arg0, %c0_i32, %c0_i32_0, %c0_i32_1 : i32, i32, i32, i32
  }
  func.func @transform_1(%arg0: i32, %arg1: i32) -> (i32, i32) {
    %c0_i32 = arith.constant 0 : i32
    %c0_i32_0 = arith.constant 0 : i32
    %c0_i32_1 = arith.constant 0 : i32
    return %c0_i32, %c0_i32_0 : i32, i32
  }
  func.func @transform_2(%arg0: i32, %arg1: i32) -> (i32, i32, i32) {
    %c0_i32 = arith.constant 0 : i32
    %c0_i32_0 = arith.constant 0 : i32
    %c0_i32_1 = arith.constant 0 : i32
    %c0_i32_2 = arith.constant 0 : i32
    return %c0_i32, %c0_i32_0, %c0_i32_1 : i32, i32, i32
  }
  func.func @transform_3(%arg0: i32, %arg1: i32) -> (i32, i32, i32) {
    %c0_i32 = arith.constant 0 : i32
    %c0_i32_0 = arith.constant 0 : i32
    %c0_i32_1 = arith.constant 0 : i32
    %c0_i32_2 = arith.constant 0 : i32
    return %c0_i32, %c0_i32_0, %c0_i32_1 : i32, i32, i32
  }
  func.func @transform_4(%arg0: i32, %arg1: i32) -> (i32, i32, i32, i32) {
    %c0_i32 = arith.constant 0 : i32
    %c0_i32_0 = arith.constant 0 : i32
    %c0_i32_1 = arith.constant 0 : i32
    return %arg0, %c0_i32, %c0_i32_0, %arg1 : i32, i32, i32, i32
  }
}

</mosaic_0001>

<bundles_post_ra>
// kernel: tpu_custom_call.1
= control target key start
LH: loop header
LB: loop body
LE: loop exit
PB: predicated region body
PF: predicated region fallthrough
CT: control target
= control target key end

     0   :  { %s3738_s0 = inlined_call_operand.hbm [shape: f32[2,16,16,128], index: 0, kind: input, shape index: {}]   ;;  %s3739_s1 = inlined_call_operand.hbm [shape: f32[9,128], index: 1, kind: input, shape index: {}]   ;;  %s3740_s2 = inlined_call_operand.hbm [shape: f32[1,128,128], index: 2, kind: input, shape index: {}]   ;;  %s3741_s3 = inlined_call_operand.vmem [shape: f32[1,1,128], index: 3, kind: input, shape index: {}]   ;;  %s3742_s4 = inlined_call_operand.hbm [shape: f32[2,16,16,128], index: 4, kind: output, shape index: {}]  }
   0x1   :  { %3901 = sst [smem:[#allocation70_spill]] %s3739_s1 }
   0x2   :  { %9 = vsyncpa [#allocation4], 0 }
   0x3   :  { %11 = vsyncpa [#allocation4 + $0x1], 0 }
   0x4   :  { %12 = vsyncpa [#allocation7], 0 }
   0x5   :  { %13 = vsyncpa [#allocation5], 0 }
   0x6   :  { %15 = vsyncpa [#allocation5 + $0x1], 0  ;;  %s2093_s15 = smov 0   ;;  %s2095_s16 = smov 0  }
   0x7   :  { %s2097_s17 = smov 0   ;;  %s2099_s18 = smov 0  }
   0x8   :  { %s2101_s19 = smov 0   ;;  %s2103_s20 = smov 0  }
   0x9 LB: > { %s1686_s21 = sadd.s32 4294967295, %s2059_s20   ;;  %s1687_s22 = sadd.s32 4294967294, %s2059_s20   ;;  %s2059_s20 = sphi %s2103_s20, %s21_s20   ;;  %s2055_s19 = sphi %s2101_s19, %s4126_s19   ;;  %s2051_s18 = sphi %s2099_s18, %s4125_s18   ;;  %s2047_s17 = sphi %s2097_s17, %s4124_s17   ;;  %s2043_s16 = sphi %s2095_s16, %s4123_s16   ;;  %s2039_s15 = sphi %s2093_s15, %s4122_s15  }
   0xa   : > { %p53_p0 = scmp.ne.s32.totalorder %s2043_s16, %s2039_s15  ;;  %p2129_p1 = scmp.eq.s32.totalorder %s1686_s21, 0 }
   0xb   : > { %p148_p2 = scmp.eq.s32.totalorder %s1687_s22, 1  ;;  %p1688_p4 = scmp.ge.s32.totalorder %s2059_s20, 1 }
   0xc   : > { %p2135_p3 = por %p2129_p1, %p53_p0  ;;  %p155_p6 = scmp.lt.s32.totalorder %s2059_s20, 3 }
   0xd   : > { %p2140_p5 = por %p148_p2, %p53_p0  ;;  %s3905_s1 = sld [smem:[#allocation70_spill]] }
   0xe   : > { %p2148_p7 = pnand %p1688_p4, %p155_p6  ;;  %s2061_s30 = smov [#allocation6]  }
   0xf   : > { %s168_s5 = sshll.u32 %s2061_s30, 4  ;;  %p1691_p10 = scmp.ge.s32.totalorder %s2059_s20, 2  ;;  %s169_s5 = int_to_ptr.vmem [resolvable:$true] %s168_s5 }
  0x10   : > { %p1767_p8 = pneg %p2148_p7  ;;  %s180_s8 = sshll.u32 %s3740_s2, 4  ;;  %s181_s8 = int_to_ptr.hbm [resolvable:$true] %s180_s8 }
  0x11   : > { %s3743_s9 = smov 128   ;;  %s2063_s10 = smov 8  }
  0x12   : > { %p1768_p9 = pnand %p1767_p8, %p2129_p1  ;;  %s2064_s11 = smov [#allocation8]  }
  0x13   : > { %s166_s28 = sshll.u32 %s3905_s1, 4  ;;  %s182_s12 = sshll.u32 %s2064_s11, 4  ;;  %s167_s28 = int_to_ptr.hbm [resolvable:$true] %s166_s28  ;;  %s183_s12 = int_to_ptr.vmem [resolvable:$true] %s182_s12 }
  0x14   : > { %1770 = dma.hbm_to_vmem [thread:$0]  (!%p1768_p9), %s167_s28, 256, %s169_s5, [#allocation7], %s3743_s9, %s3743_s9, %s2063_s10  }
  0x15   : > { %1773 = dma.hbm_to_vmem [thread:$0]  (!%p1768_p9), %s181_s8, 2048, %s183_s12, [#allocation7], %s3743_s9, %s3743_s9, %s2063_s10  }
  0x16   : > { %p142_p11 = scmp.eq.s32.totalorder %s1686_s21, 1  ;;  %s33_s13 = sadd.s32 1, %s2055_s19 }
  0x17   : > { %p35_p12 = scmp.ge.s32.totalorder %s33_s13, 2  ;;  %s40_s14 = sadd.s32 1, %s2047_s17 }
  0x18   : > { %p47_p13 = scmp.ne.s32.totalorder %s2047_s17, %s2043_s16  ;;  %p48_p0 = scmp.eq.s32.totalorder %s2059_s20, 0 }
  0x19   : > { %s4128_s13 = smov (%p35_p12, %s33_s13), 0  ;;  %p1784_p4 = scmp.lt.s32.totalorder %s2059_s20, 2 }
  0x1a   : > { %p2175_p2 = por %p142_p11, %p47_p13  ;;  %s37_s26 = ssub.s32 %s2055_s19, %s4128_s13 }
  0x1b   : > { %s199_s27 = sand.u32 1, %s2047_s17   ;;  %p38_p6 = scmp.eq.s32.totalorder %s37_s26, 0 }
  0x1c   : > { %p49_p8 = por %p48_p0, %p47_p13  ;;  %s1692_s28 = sshll.u32 %s199_s27, 8 }
  0x1d   : > { %s1705_s21 = sshll.u32 %s2055_s19, 8  ;;  %s203_s11 = scalar_lea.vmem [#allocation3], %s1692_s28 }
  0x1e   : > { %s2185_s30 = scalar_select %p38_p6, %s2047_s17, %s40_s14  }
  0x1f   : > { %s208_s7 = scalar_lea.hbm %s3738_s0, %s1705_s21  ;;  %s211_s12 = sshll.u32 %s203_s11, 4  ;;  %s212_s12 = int_to_ptr.vmem [resolvable:$true] %s211_s12 }
  0x20   : > { %s209_s8 = sshll.u32 %s208_s7, 4  ;;  %p1775_p9 = pnand %p1784_p4, %p49_p8  ;;  %s210_s8 = int_to_ptr.hbm [resolvable:$true] %s209_s8 }
  0x21   : > { %s200_s9 = scalar_lea.sflag [#allocation4], %s199_s27  ;;  %s3908_s1 = smov 128  }
  0x22   : > { %1777 = dma.hbm_to_vmem [thread:$0]  (!%p1775_p9), %s210_s8, 4096, %s212_s12, %s200_s9, %s3908_s1, %s3908_s1, %s2063_s10  }
  0x23   : > { %223 = sbr.rel (%p2148_p7) target bundleno = 388 (0x184), region = 36 }
  0x28   : > { %s2198_s14 = sand.u32 1, %s2043_s16  }
  0x29   : > { %s1696_s26 = sshll.u32 %s2198_s14, 8  ;;  %s226_s28 = scalar_lea.sflag [#allocation4], %s2198_s14 }
  0x2a   : > { %s2204_s21 = scalar_lea.vmem [#allocation3], %s1696_s26 }
  0x2b   : > { %2026 = dma.done.wait (%p2135_p3), %s226_s28, 4096  }
  0x2c   : > { %2028 = vsyncadd (%p2135_p3), %s226_s28, 4294963200 }
  0x2d   : > { %2030 = dma.done.wait (%p2129_p1), [#allocation7], 2304  }
  0x2e   : > { %2032 = vsyncadd (%p2129_p1), [#allocation7], 4294964992  ;;  %v333_v0 = vlaneseq  ;;  %v1385_v1 = vld [vmem:[#allocation8 + $0x78] sm:$0xff]  ;;  %v1384_v2 = vld [vmem:[#allocation8 + $0x70] sm:$0xff]  ;;  %v2065_v6 = vmov 0.0   ;;  %s3637_s24 = scalar_lea.vmem [#allocation9], %s1696_s26 }
  0x2f   : > { %1708 = vmatpush.msra.mxu2 %v1385_v1  ;;  %1709 = vmatpush.msra.mxu3 %v1385_v1  ;;  %v1383_v4 = vld [vmem:[#allocation8 + $0x68] sm:$0xff]  ;;  %v1382_v5 = vld [vmem:[#allocation8 + $0x60] sm:$0xff]  ;;  %v2217_v7 = vrot.slane %v2065_v6, 7  ;;  %v1381_v8 = vld [vmem:[#allocation8 + $0x58] sm:$0xff]  ;;  %v2227_v11 = vrot.slane %v2065_v6, 1  ;;  %s1706_s29 = sshll.u32 %s2051_s18, 8 }
  0x30   : > { %v2214_v3 = vshrl.u32 %v333_v0, 7  ;;  %1390 = vmatpush.msra.mxu0 %v1385_v1  ;;  %1707 = vmatpush.msra.mxu1 %v1385_v1  ;;  %v2220_v9 = vld [vmem:[%s2204_s21 + $0x68] sm:$0xff]  ;;  %v2223_v10 = vld [vmem:[%s2204_s21 + $0x70] sm:$0xff]  ;;  %v1380_v12 = vld [vmem:[#allocation8 + $0x50] sm:$0xff]  ;;  %s1580_s27 = scalar_lea.hbm %s3742_s4, %s1706_s29  ;;  %s1581_s5 = sshll.u32 %s3637_s24, 4  ;;  %s1582_s5 = int_to_ptr.vmem [resolvable:$true] %s1581_s5 }
  0x31   : > { %1711 = vmatpush.msra.mxu2 %v1384_v2  ;;  %1712 = vmatpush.msra.mxu3 %v1384_v2  ;;  %3909 = vst [vmem:[#allocation13_spill] sm:$0xff] %v2217_v7  ;;  %v2230_v13 = vld [vmem:[%s2204_s21 + $0x78] sm:$0xff]  ;;  %v2233_v14 = vld [vmem:[%s2204_s21 + $0x80] sm:$0xff]  ;;  %v2236_v15 = vld [vmem:[%s2204_s21 + $0x88] sm:$0xff]  ;;  %v3745_v16 = vrot.slane %v2220_v9, 7  ;;  %v391_v17 = vrot.slane %v2223_v10, 7 }
  0x32   : > { %1391 = vmatpush.msra.mxu0 %v1384_v2  ;;  %1710 = vmatpush.msra.mxu1 %v1384_v2  ;;  %vm336_vm0 = vcmp.ge.s32.totalorder %v2214_v3, 1  ;;  %3910 = vst [vmem:[#allocation14_spill] sm:$0xff] %v2220_v9  ;;  %vm407_vm1 = vcmp.lt.s32.totalorder %v2214_v3, 1  ;;  %vm504_vm2 = vcmp.lt.s32.totalorder %v2214_v3, 7  ;;  %v3744_v18 = vrot.slane %v2223_v10, 1  ;;  %v2242_v19 = vld [vmem:[%s2204_s21 + $0x90] sm:$0xff] }
  0x33   : > { %1714 = vmatpush.msra.mxu2 %v1383_v4  ;;  %1715 = vmatpush.msra.mxu3 %v1383_v4  ;;  %3911 = vst [vmem:[#allocation15_spill] sm:$0xff] %v2223_v10  ;;  %v2245_v20 = vld [vmem:[%s2204_s21 + $0x98] sm:$0xff]  ;;  %v392_v21 = vrot.slane %v2230_v13, 7  ;;  %v393_v22 = vrot.slane %v2233_v14, 7  ;;  %v394_v23 = vrot.slane %v2236_v15, 7  ;;  %v3761_v24 = vrot.slane %v2242_v19, 7 }
  0x34   : > { %3912 = vst [vmem:[#allocation16_spill] sm:$0xff] %v2227_v11  ;;  %1392 = vmatpush.msra.mxu0 %v1383_v4  ;;  %1713 = vmatpush.msra.mxu1 %v1383_v4  ;;  %v423_v25 = vsel %vm407_vm1, %v3745_v16, %v391_v17  ;;  %v1379_v26 = vld [vmem:[#allocation8 + $0x48] sm:$0xff]  ;;  %v3759_v29 = vrot.slane %v2230_v13, 1  ;;  %v3760_v30 = vrot.slane %v2233_v14, 1  ;;  %v2265_v31 = vld [vmem:[#allocation6 + $0x1] ss:$0 sm:$0xff] }
  0x35   : > { %3913 = vst [vmem:[#allocation17_spill] sm:$0xff] %v2236_v15  ;;  %1717 = vmatpush.msra.mxu2 %v1382_v5  ;;  %1718 = vmatpush.msra.mxu3 %v1382_v5  ;;  %v421_v27 = vsel %vm407_vm1, %v392_v21, %v393_v22  ;;  %v2261_v28 = vsel %vm336_vm0, %v423_v25, 0.0  ;;  %v1378_v32 = vld [vmem:[#allocation8 + $0x40] sm:$0xff]  ;;  %v419_v33 = vsel %vm407_vm1, %v394_v23, %v3761_v24  ;;  %v3762_v35 = vrot.slane %v2236_v15, 1  ;;  %v2277_v37 = vld [vmem:[#allocation6] ss:$0 sm:$0xff] }
  0x36   : > { %1393 = vmatpush.msra.mxu0 %v1382_v5  ;;  %1716 = vmatpush.msra.mxu1 %v1382_v5  ;;  %3914 = vst [vmem:[#allocation18_spill] sm:$0xff] %v2261_v28  ;;  %v2273_v34 = vsel %vm336_vm0, %v421_v27, 0.0  ;;  %v3763_v36 = vrot.slane %v2242_v19, 1  ;;  %v2280_v38 = vld [vmem:[%s2204_s21 + $0xa8] sm:$0xff]  ;;  %v2283_v39 = vld [vmem:[%s2204_s21 + $0xb0] sm:$0xff]  ;;  %v2287_v40 = vsel %vm336_vm0, %v419_v33, 0.0  ;;  %v2296_v42 = vsel %vm504_vm2, %v3744_v18, %v3759_v29 }
  0x37   : > { %1720 = vmatpush.msra.mxu2 %v1381_v8  ;;  %1721 = vmatpush.msra.mxu3 %v1381_v8  ;;  %3915 = vst [vmem:[#allocation19_spill] sm:$0xff] %v2273_v34  ;;  %v3758_v41 = vrot.slane %v2245_v20, 1  ;;  %v586_v43 = vmul.f32 %v2265_v31, %v2223_v10  ;;  %v2300_v44 = vld [vmem:[#allocation6 + $0x2] ss:$0 sm:$0xff]  ;;  %v1377_v45 = vld [vmem:[#allocation8 + $0x38] sm:$0xff]  ;;  %v2308_v46 = vsel %vm504_vm2, %v3760_v30, %v3762_v35  ;;  %v2353_v0 = vld [vmem:[%s2204_s21 + $0xb8] sm:$0xff] }
  0x38   : > { %1394 = vmatpush.msra.mxu0 %v1381_v8  ;;  %1719 = vmatpush.msra.mxu1 %v1381_v8  ;;  %3916 = vst [vmem:[#allocation20_spill] sm:$0xff] %v2296_v42  ;;  %v619_v47 = vmul.f32 %v2277_v37, %v2261_v28  ;;  %v2312_v48 = vld [vmem:[#allocation6 + $0x4] ss:$0 sm:$0xff]  ;;  %v2316_v49 = vmul.f32 %v2265_v31, %v2283_v39  ;;  %v2328_v52 = vld [vmem:[#allocation6 + $0x3] ss:$0 sm:$0xff]  ;;  %v3746_v1 = vrot.slane %v2280_v38, 7 }
  0x39   : > { %1723 = vmatpush.msra.mxu2 %v1380_v12  ;;  %1724 = vmatpush.msra.mxu3 %v1380_v12  ;;  %3917 = vst [vmem:[#allocation21_spill] sm:$0xff] %v2308_v46  ;;  %v2324_v50 = vsel %vm504_vm2, %v3763_v36, %v3758_v41  ;;  %v684_v51 = vmul.f32 %v2300_v44, %v2296_v42  ;;  %v2330_v53 = vld [vmem:[#allocation6 + $0x5] ss:$0 sm:$0xff]  ;;  %v2338_v58 = vld [vmem:[#allocation6 + $0x7] ss:$0 sm:$0xff]  ;;  %v2368_v8 = vld [vmem:[%s2204_s21 + $0xc8] sm:$0xff] }
  0x3a   : > { %1395 = vmatpush.msra.mxu0 %v1380_v12  ;;  %1722 = vmatpush.msra.mxu1 %v1380_v12  ;;  %v2334_v54 = vmul.f32 %v2300_v44, %v2227_v11  ;;  %v1376_v55 = vld [vmem:[#allocation8 + $0x30] sm:$0xff]  ;;  %v651_v56 = vadd.f32 %v619_v47, %v586_v43  ;;  %v770_v57 = vmul.f32 %v2312_v48, %v2233_v14  ;;  %v2350_v63 = vld [vmem:[#allocation6 + $0x8] ss:$0 sm:$0xff]  ;;  %v2371_v12 = vld [vmem:[%s2204_s21 + $0xd0] sm:$0xff]  ;;  %v3751_v47 = vrot.slane %v2283_v39, 1  ;;  %s1583_s6 = sshll.u32 %s1580_s27, 4  ;;  %s1584_s6 = int_to_ptr.hbm [resolvable:$true] %s1583_s6 }
  0x3b   : > { %1726 = vmatpush.msra.mxu2 %v1379_v26  ;;  %1727 = vmatpush.msra.mxu3 %v1379_v26  ;;  %v2342_v59 = vsel %vm407_vm1, %v393_v22, %v394_v23  ;;  %v803_v60 = vmul.f32 %v2328_v52, %v2273_v34  ;;  %v868_v61 = vmul.f32 %v2330_v53, %v2308_v46  ;;  %v2348_v62 = vld [vmem:[#allocation6 + $0x6] ss:$0 sm:$0xff]  ;;  %v3748_v22 = vrot.slane %v2283_v39, 7  ;;  %v1375_v27 = vld [vmem:[#allocation8 + $0x28] sm:$0xff]  ;;  %v1374_v18 = vld [vmem:[#allocation8 + $0x20] sm:$0xff]  ;;  %s1568_s18 = scalar_lea.sflag [#allocation5], %s2198_s14 }
  0x3c   : > { %1396 = vmatpush.msra.mxu0 %v1379_v26  ;;  %1725 = vmatpush.msra.mxu1 %v1379_v26  ;;  %3918 = vst [vmem:[#allocation22_spill] sm:$0xff] %v2342_v59  ;;  %v2360_v2 = vsel %vm407_vm1, %v391_v17, %v392_v21  ;;  %v716_v4 = vadd.f32 %v684_v51, %v651_v56  ;;  %v2365_v6 = vld [vmem:[%s2204_s21 + $0xc0] sm:$0xff]  ;;  %v3749_v23 = vrot.slane %v2353_v0, 7  ;;  %v3747_v33 = vrot.slane %v2371_v12, 7  ;;  %v1371_v41 = vld [vmem:[#allocation8 + $0x8] sm:$0xff]  ;;  %v2501_v28 = vld [vmem:[%s2204_s21 + $0x28] sm:$0xff] }
  0x3d   : > { %1729 = vmatpush.msra.mxu2 %v1378_v32  ;;  %1730 = vmatpush.msra.mxu3 %v1378_v32  ;;  %3919 = vst [vmem:[#allocation23_spill] sm:$0xff] %v2360_v2  ;;  %v1192_v5 = vmul.f32 %v2338_v58, %v2242_v19  ;;  %v835_v17 = vadd.f32 %v803_v60, %v770_v57  ;;  %v3750_v26 = vrot.slane %v2365_v6, 7  ;;  %v2390_v57 = vld [vmem:[%s2204_s21 + $0xd8] sm:$0xff]  ;;  %s1987_s7 = sshra.s32 %s1584_s6, 4  ;;  %s1993_s26 = scalar_lea.hbm %s3742_s4, 512  ;;  %s1988_s7 = int_to_ptr.hbm [resolvable:$true] %s1987_s7 }
  0x3e   : > { %1397 = vmatpush.msra.mxu0 %v1378_v32  ;;  %1728 = vmatpush.msra.mxu1 %v1378_v32  ;;  %v1225_v21 = vmul.f32 %v2348_v62, %v2287_v40  ;;  %v1290_v25 = vmul.f32 %v2350_v63, %v2324_v50  ;;  %v3755_v32 = vrot.slane %v2368_v8, 7  ;;  %v415_v43 = vsel %vm407_vm1, %v3746_v1, %v3748_v22  ;;  %v2423_v22 = vld [vmem:[%s2204_s21 + $0x10] sm:$0xff]  ;;  %v2487_v35 = vld [vmem:[%s2204_s21 + $0xf8] sm:$0xff]  ;;  %s1989_s8 = scalar_lea.hbm %s1988_s7, 256  ;;  %p1994_p11 = scmp.lt.s32.totalorder %s1988_s7, %s3742_s4 }
  0x3f   : > { %1732 = vmatpush.msra.mxu2 %v1377_v45  ;;  %1733 = vmatpush.msra.mxu3 %v1377_v45  ;;  %v900_v51 = vadd.f32 %v868_v61, %v835_v17  ;;  %v2400_v60 = vsel %vm336_vm0, %v415_v43, 0.0  ;;  %v3752_v17 = vrot.slane %v2353_v0, 1  ;;  %v2415_v43 = vld [vmem:[%s2204_s21] sm:$0xff]  ;;  %3924 = vst [vmem:[#allocation28_spill] sm:$0xff] %v2423_v22  ;;  %p1990_p1 = scmp.ne.s32.totalorder %s1988_s7, %s1989_s8  ;;  %p1995_p12 = scmp.lt.s32.totalorder %s1993_s26, %s1989_s8 }
  0x40   : > { %1398 = vmatpush.msra.mxu0 %v1377_v45  ;;  %1731 = vmatpush.msra.mxu1 %v1377_v45  ;;  %v1257_v56 = vadd.f32 %v1225_v21, %v1192_v5  ;;  %v413_v45 = vsel %vm407_vm1, %v3749_v23, %v3750_v26  ;;  %3920 = vst [vmem:[#allocation24_spill] sm:$0xff] %v2400_v60  ;;  %v3753_v21 = vrot.slane %v2365_v6, 1  ;;  %v3757_v23 = vrot.slane %v2371_v12, 1 }
  0x41   : > { %1735 = vmatpush.msra.mxu2 %v1376_v55  ;;  %1736 = vmatpush.msra.mxu3 %v1376_v55  ;;  %v411_v61 = vsel %vm407_vm1, %v3755_v32, %v3747_v33  ;;  %v2410_v5 = vsel %vm336_vm0, %v413_v45, 0.0  ;;  %3922 = vst [vmem:[#allocation26_spill] sm:$0xff] %v2415_v43  ;;  %v3754_v33 = vrot.slane %v2368_v8, 1  ;;  %v1373_v45 = vld [vmem:[#allocation8 + $0x18] sm:$0xff]  ;;  %v3756_v26 = vrot.slane %v2390_v57, 1  ;;  %p1991_p3 = pnand %p1990_p1, %p2175_p2  ;;  %p1996_p13 = por %p1995_p12, %p1994_p11 }
  0x42   : > { %1399 = vmatpush.msra.mxu0 %v1376_v55  ;;  %1734 = vmatpush.msra.mxu1 %v1376_v55  ;;  %3921 = vst [vmem:[#allocation25_spill] sm:$0xff] %v2410_v5  ;;  %v932_v55 = vadd.f32 %v900_v51, %v716_v4  ;;  %v1322_v16 = vadd.f32 %v1290_v25, %v1257_v56  ;;  %v2419_v1 = vsel %vm336_vm0, %v411_v61, 0.0  ;;  %v2438_v51 = vld [vmem:[%s2204_s21 + $0xe8] sm:$0xff]  ;;  %v2468_v32 = vrot.slane %v2423_v22, 7 }
  0x43   : > { %1738 = vmatpush.msra.mxu2 %v1375_v27  ;;  %1739 = vmatpush.msra.mxu3 %v1375_v27  ;;  %3923 = vst [vmem:[#allocation27_spill] sm:$0xff] %v2419_v1  ;;  %v2433_v4 = vsel %vm504_vm2, %v3751_v47, %v3752_v17  ;;  %v627_v25 = vmul.f32 %v2277_v37, %v2400_v60  ;;  %v2451_v47 = vrot.slane %v2415_v43, 7  ;;  %v1372_v17 = vld [vmem:[#allocation8 + $0x10] sm:$0xff]  ;;  %v2490_v36 = vrot.slane %v2415_v43, 1  ;;  %p1992_p7 = pneg %p1991_p3 }
  0x44   : > { %1400 = vmatpush.msra.mxu0 %v1375_v27  ;;  %1737 = vmatpush.msra.mxu1 %v1375_v27  ;;  %3925 = vst [vmem:[#allocation29_spill] sm:$0xff] %v2433_v4  ;;  %v1354_v27 = vadd.f32 %v1322_v16, %v932_v55  ;;  %v2446_v56 = vsel %vm504_vm2, %v3753_v21, %v3754_v33  ;;  %v2465_v33 = vld [vmem:[%s2204_s21 + $0x8] sm:$0xff] }
  0x45   : > { %1741 = vmatpush.msra.mxu2 %v1374_v18  ;;  %1742 = vmatpush.msra.mxu3 %v1374_v18  ;;  %3926 = vst [vmem:[#allocation30_spill] sm:$0xff] %v2446_v56  ;;  %v692_v61 = vmul.f32 %v2300_v44, %v2433_v4  ;;  %v2459_v16 = vsel %vm504_vm2, %v3757_v23, %v3756_v26  ;;  %v2480_v23 = vrot.slane %v2438_v51, 7  ;;  %v1370_v4 = vld [vmem:[#allocation8] sm:$0xff]  ;;  %v3933_v9 = vrot.slane %v2465_v33, 1  ;;  %p1997_p0 = pnand %p1996_p13, %p1992_p7 }
  0x46   : > { %1401 = vmatpush.msra.mxu0 %v1374_v18  ;;  %1740 = vmatpush.msra.mxu1 %v1374_v18  ;;  %3927 = vst [vmem:[#allocation31_spill] sm:$0xff] %v2459_v16  ;;  %v659_v55 = vadd.f32 %v627_v25, %v2316_v49  ;;  %v778_v21 = vmul.f32 %v2312_v48, %v2365_v6  ;;  %v2477_v25 = vld [vmem:[%s2204_s21 + $0x18] sm:$0xff] }
  0x47   : > { %1744 = vmatpush.msra.mxu2 %v1373_v45  ;;  %1745 = vmatpush.msra.mxu3 %v1373_v45  ;;  %v811_v18 = vmul.f32 %v2328_v52, %v2410_v5  ;;  %v876_v26 = vmul.f32 %v2330_v53, %v2446_v56  ;;  %v1200_v49 = vmul.f32 %v2338_v58, %v2371_v12 }
  0x48   : > { %3928 = vst [vmem:[#allocation32_spill] sm:$0xff] %v2480_v23  ;;  %1402 = vmatpush.msra.mxu0 %v1373_v45  ;;  %1743 = vmatpush.msra.mxu1 %v1373_v45  ;;  %v724_v29 = vadd.f32 %v692_v61, %v659_v55  ;;  %v1233_v30 = vmul.f32 %v2348_v62, %v2419_v1  ;;  %v2498_v55 = vrot.slane %v2423_v22, 1 }
  0x49   : > { %v1298_v24 = vmul.f32 %v2350_v63, %v2459_v16  ;;  %3929 = vst [vmem:[#allocation33_spill] sm:$0xff] %v2487_v35  ;;  %1747 = vmatpush.msra.mxu2 %v1372_v17  ;;  %1748 = vmatpush.msra.mxu3 %v1372_v17  ;;  %v843_v42 = vadd.f32 %v811_v18, %v778_v21  ;;  %v3777_v21 = vrot.slane %v2477_v25, 1  ;;  %v2507_v18 = vmul.f32 0.0, %v2265_v31 }
  0x4a   : > { %3930 = vst [vmem:[#allocation34_spill] sm:$0xff] %v2490_v36  ;;  %v439_v45 = vsel %vm407_vm1, %v2480_v23, %v2217_v7  ;;  %v1265_v60 = vadd.f32 %v1233_v30, %v1200_v49  ;;  %1403 = vmatpush.msra.mxu0 %v1372_v17  ;;  %1746 = vmatpush.msra.mxu1 %v1372_v17  ;;  %v2510_v23 = vld [vmem:[%s2204_s21 + $0x30] sm:$0xff]  ;;  %v2521_v49 = vrot.slane %v2487_v35, 7 }
  0x4b   : > { %3931 = vst [vmem:[#allocation35_spill] sm:$0xff] %v2498_v55  ;;  %v440_v10 = vsel %vm336_vm0, %v439_v45, 0.0  ;;  %1750 = vmatpush.msra.mxu2 %v1371_v41  ;;  %1751 = vmatpush.msra.mxu3 %v1371_v41  ;;  %v908_v61 = vadd.f32 %v876_v26, %v843_v42  ;;  %v2517_v30 = vsel %vm504_vm2, %v2490_v36, %v3933_v9 }
  0x4c   : > { %3932 = vst [vmem:[#allocation36_spill] sm:$0xff] %v2501_v28  ;;  %v603_v17 = vmul.f32 %v2277_v37, %v440_v10  ;;  %v1330_v45 = vadd.f32 %v1298_v24, %v1265_v60  ;;  %1404 = vmatpush.msra.mxu0 %v1371_v41  ;;  %1749 = vmatpush.msra.mxu1 %v1371_v41  ;;  %v2539_v60 = vld [vmem:[%s2204_s21 + $0x38] sm:$0xff] }
  0x4d   : > { %3934 = vst [vmem:[#allocation37_spill] sm:$0xff] %v2517_v30  ;;  %v2528_v42 = vsel %vm504_vm2, %v2498_v55, %v3777_v21  ;;  %v754_v26 = vmul.f32 %v2312_v48, %v2415_v43  ;;  %1753 = vmatpush.msra.mxu2 %v1370_v4  ;;  %1754 = vmatpush.msra.mxu3 %v1370_v4  ;;  %v2542_v21 = vld [vmem:[%s2204_s21 + $0x40] sm:$0xff]  ;;  %v2559_v43 = vld [vmem:[%s2204_s21 + $0x50] sm:$0xff] }
  0x4e   : > { %3935 = vst [vmem:[#allocation38_spill] sm:$0xff] %v2521_v49  ;;  %v940_v10 = vadd.f32 %v908_v61, %v724_v29  ;;  %v635_v24 = vadd.f32 %v603_v17, %v2507_v18  ;;  %v741_v41 = vsel %vm407_vm1, %v2521_v49, %v2451_v47  ;;  %1454 = vmatmul.f32.vlgmr.msra.gmra.mxu2 %v1354_v27  ;;  %v2556_v49 = vld [vmem:[%s2204_s21 + $0x48] sm:$0xff]  ;;  %v3795_v56 = vrot.slane %v2542_v21, 7 }
  0x4f   : > { %3936 = vst [vmem:[#allocation39_spill] sm:$0xff] %v2528_v42  ;;  %1405 = vmatpush.msra.mxu0 %v1370_v4  ;;  %v742_v9 = vsel %vm336_vm0, %v741_v41, 0.0  ;;  %v852_v29 = vmul.f32 %v2330_v53, %v2517_v30  ;;  %v1046_v61 = vsel %vm407_vm1, %v2217_v7, %v2468_v32  ;;  %v1176_v17 = vmul.f32 %v2338_v58, %v2423_v22 }
  0x50   : > { %3937 = vst [vmem:[#allocation40_spill] sm:$0xff] %v2539_v60  ;;  %v1362_v27 = vadd.f32 %v1330_v45, %v940_v10  ;;  %1752 = vmatpush.msra.mxu1 %v1370_v4  ;;  %v700_v41 = vadd.f32 %v2334_v54, %v635_v24  ;;  %v787_v35 = vmul.f32 %v2328_v52, %v742_v9  ;;  %v1047_v30 = vsel %vm336_vm0, %v1046_v61, 0.0  ;;  %v2579_v24 = vld [vmem:[%s2204_s21 + $0x58] sm:$0xff] }
  0x51   : > { %3938 = vst [vmem:[#allocation41_spill] sm:$0xff] %v2559_v43  ;;  %v1209_v16 = vmul.f32 %v2348_v62, %v1047_v30  ;;  %v1274_v1 = vmul.f32 %v2350_v63, %v2528_v42  ;;  %v3794_v22 = vrot.slane %v2539_v60, 7  ;;  %v3801_v4 = vrot.slane %v2556_v49, 7 }
  0x52   : > { %1478 = vmatmul.f32.vlgmr.msra.gmra.mxu3 %v1362_v27  ;;  %v819_v5 = vadd.f32 %v787_v35, %v754_v26  ;;  %v3796_v54 = vrot.slane %v2559_v43, 7  ;;  %v3939_v45 = vrot.slane %v2510_v23, 7  ;;  %v3940_v9 = vrot.slane %v2501_v28, 7 }
  0x53   : > { %v1241_v10 = vadd.f32 %v1209_v16, %v1176_v17  ;;  %v429_v35 = vsel %vm407_vm1, %v3794_v22, %v3795_v56  ;;  %v3797_v61 = vrot.slane %v2510_v23, 1  ;;  %v3805_v56 = vrot.slane %v2559_v43, 1 }
  0x54   : > { %v431_v30 = vsel %vm407_vm1, %v3940_v9, %v3939_v45  ;;  %v884_v27 = vadd.f32 %v852_v29, %v819_v5  ;;  %v427_v16 = vsel %vm407_vm1, %v3801_v4, %v3796_v54  ;;  %v2600_v17 = vsel %vm336_vm0, %v429_v35, 0.0 }
  0x55   : > { %v2589_v26 = vsel %vm336_vm0, %v431_v30, 0.0  ;;  %3942 = vst [vmem:[#allocation43_spill] sm:$0xff] %v2600_v17  ;;  %v3798_v45 = vrot.slane %v2539_v60, 1  ;;  %v1306_v9 = vadd.f32 %v1274_v1, %v1241_v10  ;;  %v2605_v30 = vsel %vm336_vm0, %v427_v16, 0.0 }
  0x56   : > { %3941 = vst [vmem:[#allocation42_spill] sm:$0xff] %v2589_v26  ;;  %v3799_v5 = vrot.slane %v2542_v21, 1  ;;  %v3800_v29 = vrot.slane %v2556_v49, 1  ;;  %v916_v22 = vadd.f32 %v884_v27, %v700_v41  ;;  %v3804_v54 = vrot.slane %v2579_v24, 1 }
  0x57   : > { %3943 = vst [vmem:[#allocation44_spill] sm:$0xff] %v2605_v30  ;;  %v2617_v1 = vsel %vm504_vm2, %v3797_v61, %v3798_v45  ;;  %v578_v41 = vmul.f32 %v2265_v31, %v2510_v23  ;;  %v611_v35 = vmul.f32 %v2277_v37, %v2589_v26  ;;  %v762_v45 = vmul.f32 %v2312_v48, %v2542_v21 }
  0x58   : > { %3944 = vst [vmem:[#allocation45_spill] sm:$0xff] %v2617_v1  ;;  %v2625_v10 = vsel %vm504_vm2, %v3799_v5, %v3800_v29  ;;  %v676_v27 = vmul.f32 %v2300_v44, %v2617_v1  ;;  %v1338_v16 = vadd.f32 %v1306_v9, %v916_v22  ;;  %v2639_v61 = vsel %vm504_vm2, %v3805_v56, %v3804_v54  ;;  %v2646_v29 = vld [vmem:[%s2204_s21 + $0xa0] sm:$0xff] }
  0x59   : > { %3945 = vst [vmem:[#allocation46_spill] sm:$0xff] %v2625_v10  ;;  %v795_v5 = vmul.f32 %v2328_v52, %v2600_v17  ;;  %v643_v4 = vadd.f32 %v611_v35, %v578_v41  ;;  %v860_v22 = vmul.f32 %v2330_v53, %v2625_v10  ;;  %v1184_v9 = vmul.f32 %v2338_v58, %v2559_v43 }
  0x5a   : > { %3946 = vst [vmem:[#allocation47_spill] sm:$0xff] %v2639_v61  ;;  %v1217_v1 = vmul.f32 %v2348_v62, %v2605_v30  ;;  %1406 = vmatmul.f32.vlgmr.msra.gmra.mxu0 %v1338_v16  ;;  %v1282_v56 = vmul.f32 %v2350_v63, %v2639_v61  ;;  %v2657_v26 = vadd.s32 8, %v2214_v3  ;;  %v3816_v17 = vrot.slane %v2245_v20, 7 }
  0x5b   : > { %v827_v54 = vadd.f32 %v795_v5, %v762_v45  ;;  %v708_v41 = vadd.f32 %v676_v27, %v643_v4  ;;  %v3817_v10 = vrot.slane %v2646_v29, 1  ;;  %v3947_v42 = vrot.slane %v2242_v19, 1 }
  0x5c   : > { %v1249_v35 = vadd.f32 %v1217_v1, %v1184_v9  ;;  %v3948_v28 = vrot.slane %v2236_v15, 1  ;;  %vm339_vm3 = vcmp.le.s32.totalorder %v2657_v26, 14  ;;  %v3949_v5 = vrot.slane %v2242_v19, 7 }
  0x5d   : > { %v892_v45 = vadd.f32 %v860_v22, %v827_v54  ;;  %v3951_v1 = vrot.slane %v2233_v14, 1  ;;  %v3952_v27 = vrot.slane %v2230_v13, 1  ;;  %v3964_v61 = vrot.slane %v2371_v12, 7 }
  0x5e   : > { %v516_v16 = vsel %vm504_vm2, %v3948_v28, %v3947_v42  ;;  %v2674_v4 = vsel %vm407_vm1, %v3949_v5, %v3816_v17  ;;  %v1314_v28 = vadd.f32 %v1282_v56, %v1249_v35  ;;  %v3953_v42 = vrot.slane %v2245_v20, 1 }
  0x5f   : > { %3950 = vst [vmem:[#allocation48_spill] sm:$0xff] %v2674_v4  ;;  %v518_v9 = vsel %vm504_vm2, %v3952_v27, %v3951_v1  ;;  %v2694_v5 = vsel %vm339_vm3, %v516_v16, 0.0  ;;  %v924_v17 = vadd.f32 %v892_v45, %v708_v41  ;;  %v587_v56 = vmul.f32 %v2265_v31, %v2230_v13  ;;  %v2713_v45 = vld [vmem:[%s2204_s21 + $0xe0] sm:$0xff] }
  0x60   : > { %v514_v54 = vsel %vm504_vm2, %v3953_v42, %v3817_v10  ;;  %v2690_v22 = vsel %vm339_vm3, %v518_v9, 0.0  ;;  %3955 = vst [vmem:[#allocation50_spill] sm:$0xff] %v2694_v5  ;;  %v620_v35 = vmul.f32 %v2277_v37, %v2360_v2  ;;  %v771_v9 = vmul.f32 %v2312_v48, %v2236_v15 }
  0x61   : > { %3954 = vst [vmem:[#allocation49_spill] sm:$0xff] %v2690_v22  ;;  %v2698_v1 = vsel %vm339_vm3, %v514_v54, 0.0  ;;  %v685_v27 = vmul.f32 %v2300_v44, %v2690_v22  ;;  %v804_v16 = vmul.f32 %v2328_v52, %v2342_v59  ;;  %v869_v41 = vmul.f32 %v2330_v53, %v2694_v5 }
  0x62   : > { %3956 = vst [vmem:[#allocation51_spill] sm:$0xff] %v2698_v1  ;;  %v1346_v42 = vadd.f32 %v1314_v28, %v924_v17  ;;  %v652_v54 = vadd.f32 %v620_v35, %v587_v56  ;;  %v1193_v13 = vmul.f32 %v2338_v58, %v2245_v20  ;;  %v1226_v10 = vmul.f32 %v2348_v62, %v2674_v4 }
  0x63   : > { %v836_v22 = vadd.f32 %v804_v16, %v771_v9  ;;  %v1291_v2 = vmul.f32 %v2350_v63, %v2698_v1  ;;  %v3957_v59 = vrot.slane %v2368_v8, 7  ;;  %v3958_v5 = vrot.slane %v2365_v6, 7 }
  0x64   : > { %1430 = vmatmul.f32.vlgmr.msra.gmra.mxu1 %v1346_v42  ;;  %v717_v28 = vadd.f32 %v685_v27, %v652_v54  ;;  %v1258_v56 = vadd.f32 %v1226_v10, %v1193_v13  ;;  %v3960_v35 = vrot.slane %v2353_v0, 7  ;;  %v3961_v9 = vrot.slane %v2283_v39, 7 }
  0x65   : > { %v2728_v17 = vsel %vm407_vm1, %v3958_v5, %v3957_v59  ;;  %v3833_v15 = vrot.slane %v2713_v45, 1  ;;  %v901_v1 = vadd.f32 %v869_v41, %v836_v22  ;;  %v3963_v4 = vrot.slane %v2390_v57, 7 }
  0x66   : > { %3959 = vst [vmem:[#allocation52_spill] sm:$0xff] %v2728_v17  ;;  %v2736_v16 = vsel %vm407_vm1, %v3961_v9, %v3960_v35  ;;  %v3965_v10 = vrot.slane %v2371_v12, 1  ;;  %v3966_v5 = vrot.slane %v2368_v8, 1  ;;  %v3967_v42 = vrot.slane %v2365_v6, 1 }
  0x67   : > { %3962 = vst [vmem:[#allocation53_spill] sm:$0xff] %v2736_v16  ;;  %v2745_v59 = vsel %vm407_vm1, %v3964_v61, %v3963_v4  ;;  %v3968_v22 = vrot.slane %v2353_v0, 1  ;;  %v1323_v54 = vadd.f32 %v1291_v2, %v1258_v56  ;;  %v3969_v61 = vrot.slane %v2390_v57, 1 }
  0x68   : > { %v508_v27 = vsel %vm504_vm2, %v3966_v5, %v3965_v10  ;;  %v933_v9 = vadd.f32 %v901_v1, %v717_v28  ;;  %v595_v2 = vmul.f32 %v2265_v31, %v2353_v0  ;;  %v628_v56 = vmul.f32 %v2277_v37, %v2736_v16  ;;  %v2790_v28 = vld [vmem:[%s2204_s21 + $0x20] sm:$0xff] }
  0x69   : > { %v510_v41 = vsel %vm504_vm2, %v3968_v22, %v3967_v42  ;;  %v506_v4 = vsel %vm504_vm2, %v3969_v61, %v3833_v15  ;;  %v2771_v35 = vsel %vm339_vm3, %v508_v27, 0.0  ;;  %v779_v42 = vmul.f32 %v2312_v48, %v2368_v8  ;;  %3972 = vst [vmem:[#allocation56_spill] sm:$0xff] %v2790_v28 }
  0x6a   : > { %v2767_v13 = vsel %vm339_vm3, %v510_v41, 0.0  ;;  %3971 = vst [vmem:[#allocation55_spill] sm:$0xff] %v2771_v35  ;;  %v2775_v10 = vsel %vm339_vm3, %v506_v4, 0.0  ;;  %v812_v27 = vmul.f32 %v2328_v52, %v2728_v17  ;;  %v877_v1 = vmul.f32 %v2330_v53, %v2771_v35 }
  0x6b   : > { %3970 = vst [vmem:[#allocation54_spill] sm:$0xff] %v2767_v13  ;;  %v693_v5 = vmul.f32 %v2300_v44, %v2767_v13  ;;  %v1355_v22 = vadd.f32 %v1323_v54, %v933_v9  ;;  %v660_v41 = vadd.f32 %v628_v56, %v595_v2  ;;  %v1201_v0 = vmul.f32 %v2338_v58, %v2390_v57 }
  0x6c   : > { %v1234_v61 = vmul.f32 %v2348_v62, %v2745_v59  ;;  %v844_v4 = vadd.f32 %v812_v27, %v779_v42  ;;  %v1299_v15 = vmul.f32 %v2350_v63, %v2775_v10  ;;  %v3844_v13 = vrot.slane %v2465_v33, 7 }
  0x6d   : > { %v3843_v16 = vrot.slane %v2477_v25, 7  ;;  %1457 = vmatmul.f32.gmra.mxu2 %v1355_v22  ;;  %v725_v35 = vadd.f32 %v693_v5, %v660_v41  ;;  %v3842_v54 = vrot.slane %v2790_v28, 1  ;;  %v3973_v9 = vrot.slane %v2465_v33, 1 }
  0x6e   : > { %v1266_v17 = vadd.f32 %v1234_v61, %v1201_v0  ;;  %v909_v56 = vadd.f32 %v877_v1, %v844_v4  ;;  %v2818_v5 = vsel %vm407_vm1, %v2451_v47, %v3844_v13  ;;  %v534_v27 = vsel %vm504_vm2, %v2227_v11, %v2490_v36 }
  0x6f   : > { %v532_v2 = vsel %vm504_vm2, %v3973_v9, %v2498_v55  ;;  %v2811_v42 = vsel %vm407_vm1, %v2468_v32, %v3843_v16  ;;  %3975 = vst [vmem:[#allocation58_spill] sm:$0xff] %v2818_v5  ;;  %v3976_v22 = vrot.slane %v2477_v25, 1  ;;  %v538_v0 = vsel %vm339_vm3, %v534_v27, 0.0 }
  0x70   : > { %3974 = vst [vmem:[#allocation57_spill] sm:$0xff] %v2811_v42  ;;  %v1331_v1 = vadd.f32 %v1299_v15, %v1266_v17  ;;  %v2834_v61 = vsel %vm339_vm3, %v532_v2, 0.0  ;;  %v941_v4 = vadd.f32 %v909_v56, %v725_v35  ;;  %v604_v15 = vmul.f32 %v2277_v37, %v2217_v7  ;;  %v2852_v56 = vld [vmem:[%s2204_s21 + $0x60] sm:$0xff] }
  0x71   : > { %v530_v41 = vsel %vm504_vm2, %v3976_v22, %v3842_v54  ;;  %3977 = vst [vmem:[#allocation59_spill] sm:$0xff] %v2834_v61  ;;  %v669_v17 = vmul.f32 %v2300_v44, %v538_v0  ;;  %v755_v22 = vmul.f32 %v2312_v48, %v2465_v33  ;;  %v788_v27 = vmul.f32 %v2328_v52, %v2818_v5 }
  0x72   : > { %v2838_v9 = vsel %vm339_vm3, %v530_v41, 0.0  ;;  %v853_v2 = vmul.f32 %v2330_v53, %v2834_v61  ;;  %v1177_v35 = vmul.f32 %v2338_v58, %v2477_v25  ;;  %v1363_v41 = vadd.f32 %v1331_v1, %v941_v4 }
  0x73   : > { %3978 = vst [vmem:[#allocation60_spill] sm:$0xff] %v2838_v9  ;;  %v636_v54 = vadd.f32 %v604_v15, %v2507_v18  ;;  %v1210_v0 = vmul.f32 %v2348_v62, %v2811_v42  ;;  %v1275_v16 = vmul.f32 %v2350_v63, %v2838_v9  ;;  %v820_v13 = vadd.f32 %v788_v27, %v755_v22 }
  0x74   : > { %v3979_v36 = vrot.slane %v2556_v49, 7  ;;  %v3980_v11 = vrot.slane %v2542_v21, 7  ;;  %v3982_v1 = vrot.slane %v2539_v60, 7  ;;  %v3983_v18 = vrot.slane %v2510_v23, 7  ;;  %1481 = vmatmul.f32.gmra.mxu3 %v1363_v41 }
  0x75   : > { %v701_v15 = vadd.f32 %v669_v17, %v636_v54  ;;  %v1242_v22 = vadd.f32 %v1210_v0, %v1177_v35  ;;  %v3855_v27 = vrot.slane %v2852_v56, 1  ;;  %v3985_v55 = vrot.slane %v2559_v43, 1 }
  0x76   : > { %v2866_v61 = vsel %vm407_vm1, %v3980_v11, %v3979_v36  ;;  %v2874_v4 = vsel %vm407_vm1, %v3983_v18, %v3982_v1  ;;  %v3986_v9 = vrot.slane %v2556_v49, 1  ;;  %v885_v36 = vadd.f32 %v853_v2, %v820_v13 }
  0x77   : > { %3981 = vst [vmem:[#allocation61_spill] sm:$0xff] %v2866_v61  ;;  %v3987_v42 = vrot.slane %v2579_v24, 7  ;;  %v3988_v5 = vrot.slane %v2559_v43, 7  ;;  %v3989_v54 = vrot.slane %v2542_v21, 1  ;;  %v3990_v17 = vrot.slane %v2539_v60, 1 }
  0x78   : > { %3984 = vst [vmem:[#allocation62_spill] sm:$0xff] %v2874_v4  ;;  %v524_v11 = vsel %vm504_vm2, %v3986_v9, %v3985_v55  ;;  %v1307_v55 = vadd.f32 %v1275_v16, %v1242_v22  ;;  %v3992_v13 = vrot.slane %v2579_v24, 1  ;;  %v579_v9 = vmul.f32 %v2265_v31, %v2539_v60 }
  0x79   : > { %v2889_v1 = vsel %vm407_vm1, %v3988_v5, %v3987_v42  ;;  %v526_v35 = vsel %vm504_vm2, %v3990_v17, %v3989_v54  ;;  %v2899_v41 = vsel %vm339_vm3, %v524_v11, 0.0  ;;  %v917_v2 = vadd.f32 %v885_v36, %v701_v15 }
  0x7a   : > { %3991 = vst [vmem:[#allocation63_spill] sm:$0xff] %v2899_v41  ;;  %v522_v42 = vsel %vm504_vm2, %v3992_v13, %v3855_v27  ;;  %v2909_v5 = vsel %vm339_vm3, %v526_v35, 0.0  ;;  %v612_v16 = vmul.f32 %v2277_v37, %v2874_v4  ;;  %v763_v22 = vmul.f32 %v2312_v48, %v2556_v49 }
  0x7b   : > { %3993 = vst [vmem:[#allocation64_spill] sm:$0xff] %v2909_v5  ;;  %v2915_v0 = vsel %vm339_vm3, %v522_v42, 0.0  ;;  %v677_v18 = vmul.f32 %v2300_v44, %v2909_v5  ;;  %v796_v11 = vmul.f32 %v2328_v52, %v2866_v61  ;;  %v861_v54 = vmul.f32 %v2330_v53, %v2899_v41 }
  0x7c   : > { %v1185_v15 = vmul.f32 %v2338_v58, %v2579_v24  ;;  %v1339_v36 = vadd.f32 %v1307_v55, %v917_v2  ;;  %v644_v17 = vadd.f32 %v612_v16, %v579_v9  ;;  %v1218_v35 = vmul.f32 %v2348_v62, %v2889_v1 }
  0x7d   : > { %v1283_v13 = vmul.f32 %v2350_v63, %v2915_v0  ;;  %v828_v42 = vadd.f32 %v796_v11, %v763_v22  ;;  %v3864_v27 = vrot.slane %v2646_v29, 7  ;;  %v3863_v5 = vrot.slane %v2280_v38, 1 }
  0x7e   : > { %v588_v4 = vmul.f32 %v2265_v31, %v2233_v14  ;;  %1409 = vmatmul.f32.gmra.mxu0 %v1339_v36  ;;  %v709_v60 = vadd.f32 %v677_v18, %v644_v17  ;;  %v1250_v41 = vadd.f32 %v1218_v35, %v1185_v15  ;;  %v621_v55 = vmul.f32 %v2277_v37, %v2273_v34 }
  0x7f   : > { %v686_v9 = vmul.f32 %v2300_v44, %v2308_v46  ;;  %v893_v2 = vadd.f32 %v861_v54, %v828_v42  ;;  %v3994_v16 = vrot.slane %v2245_v20, 7  ;;  %v3995_v14 = vrot.slane %v2646_v29, 1 }
  0x80   : > { %v772_v11 = vmul.f32 %v2312_v48, %v2242_v19  ;;  %v1315_v15 = vadd.f32 %v1283_v13, %v1250_v41  ;;  %v653_v36 = vadd.f32 %v621_v55, %v588_v4  ;;  %v805_v17 = vmul.f32 %v2328_v52, %v2287_v40 }
  0x81   : > { %v417_v22 = vsel %vm407_vm1, %v3994_v16, %v3864_v27  ;;  %v2953_v18 = vsel %vm504_vm2, %v3995_v14, %v3863_v5  ;;  %v925_v35 = vadd.f32 %v893_v2, %v709_v60  ;;  %v870_v42 = vmul.f32 %v2330_v53, %v2324_v50 }
  0x82   : > { %v2959_v54 = vsel %vm336_vm0, %v417_v22, 0.0  ;;  %v1194_v16 = vmul.f32 %v2338_v58, %v2646_v29  ;;  %v718_v19 = vadd.f32 %v686_v9, %v653_v36  ;;  %v837_v41 = vadd.f32 %v805_v17, %v772_v11  ;;  %v3998_v11 = vld [vmem:[#allocation25_spill] sm:$0xff]  ;;  %v3999_v17 = vld [vmem:[#allocation30_spill] sm:$0xff] }
  0x83   : > { %v1227_v14 = vmul.f32 %v2348_v62, %v2959_v54  ;;  %v1292_v13 = vmul.f32 %v2350_v63, %v2953_v18  ;;  %v3865_v4 = vrot.slane %v2713_v45, 7  ;;  %v1347_v55 = vadd.f32 %v1315_v15, %v925_v35 }
  0x84   : > { %v2973_v60 = vrot.slane %v2438_v51, 1  ;;  %v596_v2 = vmul.f32 %v2265_v31, %v2365_v6  ;;  %v902_v5 = vadd.f32 %v870_v42, %v837_v41  ;;  %v3997_v27 = vrot.slane %v2390_v57, 7 }
  0x85   : > { %v1259_v22 = vadd.f32 %v1227_v14, %v1194_v16  ;;  %v629_v36 = vmul.f32 %v2277_v37, %v3998_v11  ;;  %v694_v15 = vmul.f32 %v2300_v44, %v3999_v17  ;;  %1433 = vmatmul.f32.gmra.mxu1 %v1347_v55  ;;  %v4001_v6 = vrot.slane %v2713_v45, 1 }
  0x86   : > { %3996 = vst [vmem:[#allocation65_spill] sm:$0xff] %v2973_v60  ;;  %v409_v9 = vsel %vm407_vm1, %v3997_v27, %v3865_v4  ;;  %v780_v27 = vmul.f32 %v2312_v48, %v2371_v12  ;;  %v934_v14 = vadd.f32 %v902_v5, %v718_v19  ;;  %v4003_v4 = vld [vmem:[#allocation27_spill] sm:$0xff]  ;;  %v3870_v34 = vrot.slane %v2790_v28, 7 }
  0x87   : > { %v1324_v35 = vadd.f32 %v1292_v13, %v1259_v22  ;;  %v2989_v16 = vsel %vm336_vm0, %v409_v9, 0.0  ;;  %v2996_v42 = vsel %vm504_vm2, %v4001_v6, %v2973_v60  ;;  %v661_v41 = vadd.f32 %v629_v36, %v596_v2  ;;  %v4004_v13 = vld [vmem:[#allocation31_spill] sm:$0xff] }
  0x88   : > { %4000 = vst [vmem:[#allocation66_spill] sm:$0xff] %v2989_v16  ;;  %v813_v55 = vmul.f32 %v2328_v52, %v4003_v4  ;;  %v878_v22 = vmul.f32 %v2330_v53, %v4004_v13  ;;  %v1202_v9 = vmul.f32 %v2338_v58, %v2713_v45  ;;  %v1235_v46 = vmul.f32 %v2348_v62, %v2989_v16 }
  0x89   : > { %4002 = vst [vmem:[#allocation67_spill] sm:$0xff] %v2996_v42  ;;  %v1300_v6 = vmul.f32 %v2350_v63, %v2996_v42  ;;  %v1356_v17 = vadd.f32 %v1324_v35, %v934_v14  ;;  %v726_v5 = vadd.f32 %v694_v15, %v661_v41  ;;  %v4005_v2 = vrot.slane %v2465_v33, 7  ;;  %v4009_v14 = vld [vmem:[#allocation36_spill] sm:$0xff] }
  0x8a   : > { %v845_v19 = vadd.f32 %v813_v55, %v780_v27  ;;  %v1267_v11 = vadd.f32 %v1235_v46, %v1202_v9  ;;  %v4006_v13 = vrot.slane %v2477_v25, 7  ;;  %v437_v15 = vsel %vm407_vm1, %v2217_v7, %v2451_v47 }
  0x8b   : > { %v435_v36 = vsel %vm407_vm1, %v4005_v2, %v2468_v32  ;;  %1460 = vmatmul.f32.gmra.mxu2 %v1356_v17  ;;  %v442_v46 = vsel %vm336_vm0, %v437_v15, 0.0  ;;  %v3871_v41 = vrot.slane %v4009_v14, 1  ;;  %v4011_v2 = vld [vmem:[#allocation37_spill] sm:$0xff] }
  0x8c   : > { %v433_v16 = vsel %vm407_vm1, %v4006_v13, %v3870_v34  ;;  %v3028_v35 = vsel %vm336_vm0, %v435_v36, 0.0  ;;  %v910_v27 = vadd.f32 %v878_v22, %v845_v19  ;;  %v1332_v55 = vadd.f32 %v1300_v6, %v1267_v11  ;;  %v4010_v13 = vld [vmem:[#allocation26_spill] sm:$0xff]  ;;  %v4014_v19 = vld [vmem:[#allocation28_spill] sm:$0xff] }
  0x8d   : > { %4007 = vst [vmem:[#allocation27_spill] sm:$0xff] %v3028_v35  ;;  %v3034_v32 = vsel %vm336_vm0, %v433_v16, 0.0  ;;  %v572_v9 = vmul.f32 %v2265_v31, %v4010_v13  ;;  %v605_v47 = vmul.f32 %v2277_v37, %v442_v46  ;;  %v670_v36 = vmul.f32 %v2300_v44, %v4011_v2  ;;  %v4015_v46 = vld [vmem:[#allocation39_spill] sm:$0xff] }
  0x8e   : > { %4008 = vst [vmem:[#allocation68_spill] sm:$0xff] %v3034_v32  ;;  %v942_v17 = vadd.f32 %v910_v27, %v726_v5  ;;  %v4012_v22 = vrot.slane %v2790_v28, 1  ;;  %v756_v11 = vmul.f32 %v2312_v48, %v4014_v19  ;;  %v789_v6 = vmul.f32 %v2328_v52, %v3028_v35  ;;  %v4016_v35 = vld [vmem:[#allocation14_spill] sm:$0xff] }
  0x8f   : > { %v637_v15 = vadd.f32 %v605_v47, %v572_v9  ;;  %v854_v13 = vmul.f32 %v2330_v53, %v4015_v46  ;;  %v1178_v5 = vmul.f32 %v2338_v58, %v2790_v28  ;;  %v1211_v27 = vmul.f32 %v2348_v62, %v3034_v32 }
  0x90   : > { %v3048_v16 = vsel %vm504_vm2, %v4012_v22, %v3871_v41  ;;  %v1364_v2 = vadd.f32 %v1332_v55, %v942_v17  ;;  %v821_v34 = vadd.f32 %v789_v6, %v756_v11  ;;  %v3877_v41 = vrot.slane %v2852_v56, 7  ;;  %v4018_v17 = vld [vmem:[#allocation43_spill] sm:$0xff]  ;;  %v4019_v6 = vld [vmem:[#allocation46_spill] sm:$0xff] }
  0x91   : > { %4013 = vst [vmem:[#allocation36_spill] sm:$0xff] %v3048_v16  ;;  %v1276_v22 = vmul.f32 %v2350_v63, %v3048_v16  ;;  %v702_v7 = vadd.f32 %v670_v36, %v637_v15  ;;  %v1243_v19 = vadd.f32 %v1211_v27, %v1178_v5  ;;  %v3878_v9 = vrot.slane %v4016_v35, 1 }
  0x92   : > { %v580_v47 = vmul.f32 %v2265_v31, %v2542_v21  ;;  %1484 = vmatmul.f32.gmra.mxu3 %v1364_v2  ;;  %v886_v46 = vadd.f32 %v854_v13, %v821_v34  ;;  %v4017_v32 = vrot.slane %v2579_v24, 7  ;;  %v613_v11 = vmul.f32 %v2277_v37, %v4018_v17  ;;  %v4023_v2 = vld [vmem:[#allocation47_spill] sm:$0xff] }
  0x93   : > { %v678_v36 = vmul.f32 %v2300_v44, %v4019_v6  ;;  %v1308_v15 = vadd.f32 %v1276_v22, %v1243_v19  ;;  %v4021_v34 = vrot.slane %v2852_v56, 1  ;;  %v797_v19 = vmul.f32 %v2328_v52, %v2605_v30 }
  0x94   : > { %v425_v55 = vsel %vm407_vm1, %v4017_v32, %v3877_v41  ;;  %v764_v32 = vmul.f32 %v2312_v48, %v2559_v43  ;;  %v918_v13 = vadd.f32 %v886_v46, %v702_v7  ;;  %v645_v27 = vadd.f32 %v613_v11, %v580_v47  ;;  %v4030_v43 = vld [vmem:[#allocation17_spill] sm:$0xff] }
  0x95   : > { %v3078_v5 = vsel %vm336_vm0, %v425_v55, 0.0  ;;  %v3086_v21 = vsel %vm504_vm2, %v4021_v34, %v3878_v9  ;;  %v862_v22 = vmul.f32 %v2330_v53, %v4023_v2  ;;  %v1186_v55 = vmul.f32 %v2338_v58, %v2852_v56 }
  0x96   : > { %4020 = vst [vmem:[#allocation26_spill] sm:$0xff] %v3078_v5  ;;  %v1219_v41 = vmul.f32 %v2348_v62, %v3078_v5  ;;  %v1284_v34 = vmul.f32 %v2350_v63, %v3086_v21  ;;  %v4024_v9 = vrot.slane %v2280_v38, 7  ;;  %v4025_v7 = vrot.slane %v2646_v29, 7 }
  0x97   : > { %4022 = vst [vmem:[#allocation37_spill] sm:$0xff] %v3086_v21  ;;  %v1340_v47 = vadd.f32 %v1308_v15, %v918_v13  ;;  %v710_v11 = vadd.f32 %v678_v36, %v645_v27  ;;  %v829_v6 = vadd.f32 %v797_v19, %v764_v32  ;;  %v4027_v17 = vrot.slane %v2283_v39, 1  ;;  %v4032_v39 = vld [vmem:[#allocation50_spill] sm:$0xff]  ;;  %v4034_v19 = vld [vmem:[#allocation51_spill] sm:$0xff] }
  0x98   : > { %v3106_v46 = vsel %vm407_vm1, %v4025_v7, %v4024_v9  ;;  %v4028_v2 = vrot.slane %v2280_v38, 1  ;;  %v1251_v30 = vadd.f32 %v1219_v41, %v1186_v55  ;;  %v589_v9 = vmul.f32 %v2265_v31, %v4030_v43  ;;  %v4031_v7 = vld [vmem:[#allocation22_spill] sm:$0xff]  ;;  %v4033_v41 = vld [vmem:[#allocation48_spill] sm:$0xff] }
  0x99   : > { %4026 = vst [vmem:[#allocation14_spill] sm:$0xff] %v3106_v46  ;;  %v622_v36 = vmul.f32 %v2277_v37, %v4031_v7  ;;  %1412 = vmatmul.f32.gmra.mxu0 %v1340_v47  ;;  %v894_v15 = vadd.f32 %v862_v22, %v829_v6  ;;  %v687_v32 = vmul.f32 %v2300_v44, %v4032_v39  ;;  %v4035_v7 = vld [vmem:[#allocation32_spill] sm:$0xff] }
  0x9a   : > { %v512_v5 = vsel %vm504_vm2, %v4028_v2, %v4027_v17  ;;  %v773_v17 = vmul.f32 %v2312_v48, %v2245_v20  ;;  %v806_v13 = vmul.f32 %v2328_v52, %v4033_v41  ;;  %v871_v2 = vmul.f32 %v2330_v53, %v4034_v19  ;;  %v3137_v20 = vld [vmem:[%s2204_s21 + $0xf0] sm:$0xff] }
  0x9b   : > { %v3116_v21 = vsel %vm339_vm3, %v512_v5, 0.0  ;;  %v1316_v5 = vadd.f32 %v1284_v34, %v1251_v30  ;;  %v654_v27 = vadd.f32 %v622_v36, %v589_v9  ;;  %v1195_v43 = vmul.f32 %v2338_v58, %v2280_v38 }
  0x9c   : > { %4029 = vst [vmem:[#allocation69_spill] sm:$0xff] %v3116_v21  ;;  %v926_v55 = vadd.f32 %v894_v15, %v710_v11  ;;  %v838_v47 = vadd.f32 %v806_v13, %v773_v17  ;;  %v1228_v6 = vmul.f32 %v2348_v62, %v3106_v46  ;;  %v1293_v22 = vmul.f32 %v2350_v63, %v3116_v21  ;;  %v4037_v11 = vld [vmem:[#allocation52_spill] sm:$0xff]  ;;  %v4038_v13 = vld [vmem:[#allocation55_spill] sm:$0xff] }
  0x9d   : > { %v719_v39 = vadd.f32 %v687_v32, %v654_v27  ;;  %v4036_v30 = vrot.slane %v2713_v45, 7  ;;  %v597_v38 = vmul.f32 %v2265_v31, %v2368_v8  ;;  %v630_v9 = vmul.f32 %v2277_v37, %v4037_v11 }
  0x9e   : > { %v1348_v36 = vadd.f32 %v1316_v5, %v926_v55  ;;  %v903_v15 = vadd.f32 %v871_v2, %v838_v47  ;;  %v1260_v17 = vadd.f32 %v1228_v6, %v1195_v43  ;;  %v695_v21 = vmul.f32 %v2300_v44, %v4038_v13 }
  0x9f   : > { %v3144_v34 = vsel %vm407_vm1, %v4036_v30, %v4035_v7  ;;  %v662_v32 = vadd.f32 %v630_v9, %v597_v38  ;;  %v3889_v27 = vrot.slane %v3137_v20, 1  ;;  %v781_v46 = vmul.f32 %v2312_v48, %v2390_v57 }
  0xa0   : > { %v814_v30 = vmul.f32 %v2328_v52, %v2745_v59  ;;  %1436 = vmatmul.f32.gmra.mxu1 %v1348_v36  ;;  %v935_v8 = vadd.f32 %v903_v15, %v719_v39  ;;  %v1325_v19 = vadd.f32 %v1293_v22, %v1260_v17  ;;  %v879_v5 = vmul.f32 %v2330_v53, %v2775_v10 }
  0xa1   : > { %v1203_v2 = vmul.f32 %v2338_v58, %v2438_v51  ;;  %v727_v43 = vadd.f32 %v695_v21, %v662_v32  ;;  %v748_v55 = vsel %vm504_vm2, %v2973_v60, %v3889_v27  ;;  %v1236_v47 = vmul.f32 %v2348_v62, %v3144_v34 }
  0xa2   : > { %v846_v57 = vadd.f32 %v814_v30, %v781_v46  ;;  %v1357_v6 = vadd.f32 %v1325_v19, %v935_v8  ;;  %v3170_v39 = vsel %vm339_vm3, %v748_v55, 0.0  ;;  %v4039_v22 = vrot.slane %v4009_v14, 7  ;;  %v4043_v30 = vld [vmem:[#allocation58_spill] sm:$0xff]  ;;  %v4044_v55 = vld [vmem:[#allocation59_spill] sm:$0xff] }
  0xa3   : > { %v4040_v51 = vrot.slane %v2790_v28, 7  ;;  %v4041_v38 = vrot.slane %v2510_v23, 1  ;;  %v4042_v46 = vrot.slane %v4009_v14, 1  ;;  %v1268_v36 = vadd.f32 %v1236_v47, %v1203_v2  ;;  %v4045_v47 = vld [vmem:[#allocation57_spill] sm:$0xff] }
  0xa4   : > { %v911_v19 = vadd.f32 %v879_v5, %v846_v57  ;;  %v1301_v15 = vmul.f32 %v2350_v63, %v3170_v39  ;;  %1463 = vmatmul.f32.gmra.mxu2 %v1357_v6  ;;  %v573_v32 = vmul.f32 %v2265_v31, %v2465_v33  ;;  %v606_v8 = vmul.f32 %v2277_v37, %v4043_v30 }
  0xa5   : > { %v3178_v21 = vsel %vm407_vm1, %v4040_v51, %v4039_v22  ;;  %v528_v9 = vsel %vm504_vm2, %v4042_v46, %v4041_v38  ;;  %v671_v22 = vmul.f32 %v2300_v44, %v4044_v55  ;;  %v757_v5 = vmul.f32 %v2312_v48, %v2477_v25  ;;  %v4046_v38 = vld [vmem:[#allocation60_spill] sm:$0xff] }
  0xa6   : > { %v3190_v17 = vsel %vm339_vm3, %v528_v9, 0.0  ;;  %v943_v2 = vadd.f32 %v911_v19, %v727_v43  ;;  %v1333_v57 = vadd.f32 %v1301_v15, %v1268_v36  ;;  %v790_v51 = vmul.f32 %v2328_v52, %v4045_v47  ;;  %v4049_v15 = vld [vmem:[#allocation15_spill] sm:$0xff] }
  0xa7   : > { %v855_v6 = vmul.f32 %v2330_v53, %v4046_v38  ;;  %v638_v46 = vadd.f32 %v606_v8, %v573_v32  ;;  %v1179_v33 = vmul.f32 %v2338_v58, %v4009_v14  ;;  %v1212_v9 = vmul.f32 %v2348_v62, %v3178_v21 }
  0xa8   : > { %v1277_v30 = vmul.f32 %v2350_v63, %v3190_v17  ;;  %v1365_v55 = vadd.f32 %v1333_v57, %v943_v2  ;;  %v822_v25 = vadd.f32 %v790_v51, %v757_v5  ;;  %v4047_v43 = vrot.slane %v4016_v35, 7 }
  0xa9   : > { %v4048_v19 = vrot.slane %v2852_v56, 7  ;;  %v4050_v32 = vrot.slane %v4049_v15, 1  ;;  %v4051_v8 = vrot.slane %v4016_v35, 1  ;;  %v703_v60 = vadd.f32 %v671_v22, %v638_v46  ;;  %v3253_v15 = vld [vmem:[#allocation6] ss:$0 sm:$0xff] }
  0xaa   : > { %v1244_v13 = vadd.f32 %v1212_v9, %v1179_v33  ;;  %v581_v2 = vmul.f32 %v2265_v31, %v2556_v49  ;;  %1487 = vmatmul.f32.gmra.mxu3 %v1365_v55  ;;  %v887_v57 = vadd.f32 %v855_v6, %v822_v25  ;;  %v614_v51 = vmul.f32 %v2277_v37, %v2866_v61  ;;  %v3241_v31 = vld [vmem:[%s2204_s21 + $0x68] sm:$0xff]  ;;  %v3250_v25 = vld [vmem:[#allocation6 + $0x1] ss:$0 sm:$0xff] }
  0xab   : > { %v3216_v36 = vsel %vm407_vm1, %v4048_v19, %v4047_v43  ;;  %v520_v27 = vsel %vm504_vm2, %v4051_v8, %v4050_v32  ;;  %v4052_v43 = vld [vmem:[#allocation63_spill] sm:$0xff]  ;;  %v765_v22 = vmul.f32 %v2312_v48, %v2579_v24  ;;  %v863_v33 = vmul.f32 %v2330_v53, %v2915_v0 }
  0xac   : > { %v3226_v5 = vsel %vm339_vm3, %v520_v27, 0.0  ;;  %v679_v35 = vmul.f32 %v2300_v44, %v4052_v43  ;;  %v1309_v46 = vadd.f32 %v1277_v30, %v1244_v13  ;;  %v798_v27 = vmul.f32 %v2328_v52, %v2889_v1  ;;  %v1854_v30 = vld [vmem:[%s2204_s21 + $0x90] sm:$0xff] }
  0xad   : > { %v1187_v49 = vmul.f32 %v3241_v31, %v2338_v58  ;;  %v919_v6 = vadd.f32 %v887_v57, %v703_v60  ;;  %v646_v37 = vadd.f32 %v614_v51, %v581_v2  ;;  %v1220_v9 = vmul.f32 %v2348_v62, %v3216_v36 }
  0xae   : > { %v1285_v55 = vmul.f32 %v2350_v63, %v3226_v5  ;;  %v830_v13 = vadd.f32 %v798_v27, %v765_v22  ;;  %v590_v19 = vmul.f32 %v3250_v25, %v1854_v30  ;;  %v623_v32 = vmul.f32 %v3253_v15, %v2287_v40  ;;  %v3266_v40 = vld [vmem:[%s2204_s21 + $0xb0] sm:$0xff] }
  0xaf   : > { %v688_v60 = vmul.f32 %v2300_v44, %v2324_v50  ;;  %v1341_v8 = vadd.f32 %v1309_v46, %v919_v6  ;;  %v711_v2 = vadd.f32 %v679_v35, %v646_v37  ;;  %v1252_v57 = vadd.f32 %v1220_v9, %v1187_v49  ;;  %v4053_v50 = vld [vmem:[#allocation24_spill] sm:$0xff]  ;;  %v4054_v46 = vld [vmem:[#allocation29_spill] sm:$0xff]  ;;  %v3278_v9 = vld [vmem:[#allocation6 + $0x2] ss:$0 sm:$0xff] }
  0xb0   : > { %v774_v51 = vmul.f32 %v2312_v48, %v2646_v29  ;;  %v895_v22 = vadd.f32 %v863_v33, %v830_v13  ;;  %v655_v27 = vadd.f32 %v623_v32, %v590_v19  ;;  %v807_v43 = vmul.f32 %v2328_v52, %v2959_v54 }
  0xb1   : > { %v872_v30 = vmul.f32 %v2330_v53, %v2953_v18  ;;  %1415 = vmatmul.f32.gmra.mxu0 %v1341_v8  ;;  %v1317_v61 = vadd.f32 %v1285_v55, %v1252_v57  ;;  %v1196_v44 = vmul.f32 %v3266_v40, %v2338_v58  ;;  %v1229_v35 = vmul.f32 %v2348_v62, %v4053_v50  ;;  %v4055_v55 = vld [vmem:[#allocation31_spill] sm:$0xff] }
  0xb2   : > { %v1294_v48 = vmul.f32 %v2350_v63, %v4054_v46  ;;  %v927_v33 = vadd.f32 %v895_v22, %v711_v2  ;;  %v720_v49 = vadd.f32 %v688_v60, %v655_v27  ;;  %v839_v6 = vadd.f32 %v807_v43, %v774_v51  ;;  %v4056_v63 = vld [vmem:[#allocation33_spill] sm:$0xff]  ;;  %v3286_v43 = vld [vmem:[#allocation6 + $0x4] ss:$0 sm:$0xff]  ;;  %v3295_v2 = vld [vmem:[#allocation6 + $0x3] ss:$0 sm:$0xff] }
  0xb3   : > { %v598_v52 = vmul.f32 %v3250_v25, %v2371_v12  ;;  %v1261_v53 = vadd.f32 %v1229_v35, %v1196_v44  ;;  %v631_v37 = vmul.f32 %v3253_v15, %v4003_v4  ;;  %v696_v58 = vmul.f32 %v3278_v9, %v4055_v55  ;;  %v3310_v44 = vld [vmem:[#allocation6 + $0x5] ss:$0 sm:$0xff] }
  0xb4   : > { %v3892_v62 = vrot.slane %v3137_v20, 7  ;;  %v1349_v13 = vadd.f32 %v1317_v61, %v927_v33  ;;  %v904_v19 = vadd.f32 %v872_v30, %v839_v6  ;;  %v3284_v32 = vrot.slane %v4056_v63, 1  ;;  %v4057_v61 = vld [vmem:[#allocation66_spill] sm:$0xff]  ;;  %v3314_v33 = vld [vmem:[#allocation6 + $0x7] ss:$0 sm:$0xff] }
  0xb5   : > { %v782_v12 = vmul.f32 %v3286_v43, %v2713_v45  ;;  %v1326_v60 = vadd.f32 %v1294_v48, %v1261_v53  ;;  %v663_v8 = vadd.f32 %v631_v37, %v598_v52  ;;  %v815_v57 = vmul.f32 %v3295_v2, %v4057_v61  ;;  %v3318_v6 = vld [vmem:[#allocation6 + $0x6] ss:$0 sm:$0xff]  ;;  %v3322_v37 = vld [vmem:[#allocation6 + $0x8] ss:$0 sm:$0xff] }
  0xb6   : > { %v740_v4 = vsel %vm407_vm1, %v4035_v7, %v3892_v62  ;;  %1439 = vmatmul.f32.gmra.mxu1 %v1349_v13  ;;  %v936_v51 = vadd.f32 %v904_v19, %v720_v49  ;;  %v4059_v27 = vrot.slane %v3137_v20, 1  ;;  %v880_v7 = vmul.f32 %v3310_v44, %v2996_v42  ;;  %v4061_v13 = vld [vmem:[#allocation28_spill] sm:$0xff]  ;;  %v4062_v19 = vld [vmem:[#allocation27_spill] sm:$0xff] }
  0xb7   : > { %v3301_v22 = vsel %vm336_vm0, %v740_v4, 0.0  ;;  %v728_v35 = vadd.f32 %v696_v58, %v663_v8  ;;  %v847_v48 = vadd.f32 %v815_v57, %v782_v12  ;;  %v1204_v49 = vmul.f32 %v3314_v33, %v3137_v20  ;;  %v4063_v57 = vld [vmem:[#allocation39_spill] sm:$0xff] }
  0xb8   : > { %4058 = vst [vmem:[#allocation17_spill] sm:$0xff] %v3301_v22  ;;  %v3308_v30 = vsel %vm504_vm2, %v4059_v27, %v3284_v32  ;;  %v1237_v52 = vmul.f32 %v3318_v6, %v3301_v22  ;;  %v1358_v53 = vadd.f32 %v1326_v60, %v936_v51  ;;  %v574_v58 = vmul.f32 %v3250_v25, %v4061_v13  ;;  %v4064_v51 = vld [vmem:[#allocation68_spill] sm:$0xff] }
  0xb9   : > { %4060 = vst [vmem:[#allocation48_spill] sm:$0xff] %v3308_v30  ;;  %v1302_v55 = vmul.f32 %v3322_v37, %v3308_v30  ;;  %v607_v12 = vmul.f32 %v3253_v15, %v4062_v19  ;;  %v912_v8 = vadd.f32 %v880_v7, %v847_v48  ;;  %v672_v27 = vmul.f32 %v3278_v9, %v4063_v57  ;;  %v4065_v48 = vld [vmem:[#allocation42_spill] sm:$0xff] }
  0xba   : > { %v1269_v4 = vadd.f32 %v1237_v52, %v1204_v49  ;;  %v758_v62 = vmul.f32 %v3286_v43, %v2790_v28  ;;  %1466 = vmatmul.f32.gmra.mxu2 %v1358_v53  ;;  %v791_v11 = vmul.f32 %v3295_v2, %v4064_v51  ;;  %v856_v30 = vmul.f32 %v3310_v44, %v3048_v16  ;;  %v4066_v52 = vld [vmem:[#allocation45_spill] sm:$0xff]  ;;  %v4068_v28 = vld [vmem:[#allocation44_spill] sm:$0xff] }
  0xbb   : > { %v639_v60 = vadd.f32 %v607_v12, %v574_v58  ;;  %v1180_v13 = vmul.f32 %v3314_v33, %v2510_v23  ;;  %v944_v19 = vadd.f32 %v912_v8, %v728_v35  ;;  %v1213_v49 = vmul.f32 %v3318_v6, %v4065_v48  ;;  %v4067_v12 = vld [vmem:[#allocation41_spill] sm:$0xff]  ;;  %v4069_v23 = vld [vmem:[#allocation47_spill] sm:$0xff] }
  0xbc   : > { %v1334_v7 = vadd.f32 %v1302_v55, %v1269_v4  ;;  %v1278_v57 = vmul.f32 %v3322_v37, %v4066_v52  ;;  %v823_v58 = vadd.f32 %v791_v11, %v758_v62  ;;  %v582_v51 = vmul.f32 %v3250_v25, %v4067_v12  ;;  %v4070_v52 = vld [vmem:[#allocation26_spill] sm:$0xff]  ;;  %v4071_v62 = vld [vmem:[#allocation37_spill] sm:$0xff] }
  0xbd   : > { %v704_v53 = vadd.f32 %v672_v27, %v639_v60  ;;  %v615_v16 = vmul.f32 %v3253_v15, %v4068_v28  ;;  %v1245_v42 = vadd.f32 %v1213_v49, %v1180_v13  ;;  %v680_v35 = vmul.f32 %v3278_v9, %v4069_v23  ;;  %v3357_v60 = vld [vmem:[%s2204_s21 + $0x70] sm:$0xff]  ;;  %v4074_v49 = vld [vmem:[#allocation20_spill] sm:$0xff]  ;;  %v1866_v12 = vld [vmem:[%s2204_s21 + $0x98] sm:$0xff] }
  0xbe   : > { %v1366_v22 = vadd.f32 %v1334_v7, %v944_v19  ;;  %v766_v55 = vmul.f32 %v3286_v43, %v2852_v56  ;;  %v888_v8 = vadd.f32 %v856_v30, %v823_v58  ;;  %v799_v11 = vmul.f32 %v3295_v2, %v4070_v52  ;;  %4072 = vst [vmem:[#allocation32_spill] sm:$0xff] %v3357_v60  ;;  %v4073_v19 = vld [vmem:[#allocation18_spill] sm:$0xff] }
  0xbf   : > { %v647_v4 = vadd.f32 %v615_v16, %v582_v51  ;;  %v864_v27 = vmul.f32 %v3310_v44, %v4071_v62  ;;  %v1310_v28 = vadd.f32 %v1278_v57, %v1245_v42  ;;  %v1188_v13 = vmul.f32 %v3357_v60, %v3314_v33  ;;  %v4075_v57 = vld [vmem:[#allocation51_spill] sm:$0xff]  ;;  %v3372_v62 = vld [vmem:[%s2204_s21 + $0xa8] sm:$0xff] }
  0xc0   : > { %1490 = vmatmul.f32.gmra.mxu3 %v1366_v22  ;;  %v1221_v7 = vmul.f32 %v3318_v6, %v4073_v19  ;;  %v1286_v16 = vmul.f32 %v3322_v37, %v4074_v49  ;;  %v920_v30 = vadd.f32 %v888_v8, %v704_v53  ;;  %v831_v58 = vadd.f32 %v799_v11, %v766_v55 }
  0xc1   : > { %v712_v51 = vadd.f32 %v680_v35, %v647_v4  ;;  %v591_v23 = vmul.f32 %v1866_v12, %v3250_v25  ;;  %v624_v42 = vmul.f32 %v3253_v15, %v4033_v41  ;;  %v689_v60 = vmul.f32 %v3278_v9, %v4075_v57  ;;  %4076 = vst [vmem:[#allocation58_spill] sm:$0xff] %v3372_v62  ;;  %v4077_v35 = vld [vmem:[#allocation14_spill] sm:$0xff]  ;;  %v4078_v4 = vld [vmem:[#allocation69_spill] sm:$0xff] }
  0xc2   : > { %v1253_v22 = vadd.f32 %v1221_v7, %v1188_v13  ;;  %v775_v49 = vmul.f32 %v3372_v62, %v3286_v43  ;;  %v1342_v53 = vadd.f32 %v1310_v28, %v920_v30  ;;  %v896_v8 = vadd.f32 %v864_v27, %v831_v58  ;;  %v3381_v41 = vld [vmem:[%s2204_s21 + $0xb8] sm:$0xff]  ;;  %v4080_v57 = vld [vmem:[#allocation53_spill] sm:$0xff] }
  0xc3   : > { %v808_v55 = vmul.f32 %v3295_v2, %v4077_v35  ;;  %v873_v11 = vmul.f32 %v3310_v44, %v4078_v4  ;;  %v656_v7 = vadd.f32 %v624_v42, %v591_v23  ;;  %4079 = vst [vmem:[#allocation59_spill] sm:$0xff] %v3381_v41  ;;  %v1197_v12 = vmul.f32 %v3381_v41, %v3314_v33  ;;  %v4081_v30 = vld [vmem:[#allocation54_spill] sm:$0xff] }
  0xc4   : > { %v1318_v13 = vadd.f32 %v1286_v16, %v1253_v22  ;;  %v1230_v19 = vmul.f32 %v3318_v6, %v4080_v57  ;;  %1418 = vmatmul.f32.gmra.mxu0 %v1342_v53  ;;  %v928_v28 = vadd.f32 %v896_v8, %v712_v51  ;;  %v1295_v58 = vmul.f32 %v3322_v37, %v4081_v30  ;;  %v1869_v35 = vld [vmem:[%s2204_s21 + $0xd8] sm:$0xff]  ;;  %v3403_v53 = vld [vmem:[%s2204_s21 + $0xe8] sm:$0xff] }
  0xc5   : > { %v840_v27 = vadd.f32 %v808_v55, %v775_v49  ;;  %v599_v4 = vmul.f32 %v1869_v35, %v3250_v25  ;;  %v721_v16 = vadd.f32 %v689_v60, %v656_v7  ;;  %v632_v22 = vmul.f32 %v3253_v15, %v2745_v59  ;;  %v4082_v57 = vld [vmem:[#allocation38_spill] sm:$0xff]  ;;  %v4084_v55 = vld [vmem:[#allocation16_spill] sm:$0xff] }
  0xc6   : > { %v1262_v23 = vadd.f32 %v1230_v19, %v1197_v12  ;;  %v697_v42 = vmul.f32 %v3278_v9, %v2775_v10  ;;  %v1350_v41 = vadd.f32 %v1318_v13, %v928_v28  ;;  %v4083_v51 = vrot.slane %v3137_v20, 7 }
  0xc7   : > { %v905_v62 = vadd.f32 %v873_v11, %v840_v27  ;;  %v783_v60 = vmul.f32 %v3403_v53, %v3286_v43  ;;  %v664_v59 = vadd.f32 %v632_v22, %v599_v4  ;;  %v816_v10 = vmul.f32 %v3295_v2, %v3144_v34  ;;  %v1871_v27 = vld [vmem:[%s2204_s21 + $0x18] sm:$0xff] }
  0xc8   : > { %v3400_v49 = vsel %vm407_vm1, %v4083_v51, %v4082_v57  ;;  %v1327_v19 = vadd.f32 %v1295_v58, %v1262_v23  ;;  %v881_v8 = vmul.f32 %v3310_v44, %v3170_v39  ;;  %1442 = vmatmul.f32.gmra.mxu1 %v1350_v41  ;;  %v1112_v11 = vsel %vm504_vm2, %v3284_v32, %v4084_v55 }
  0xc9   : > { %v937_v35 = vadd.f32 %v905_v62, %v721_v16  ;;  %v1205_v13 = vmul.f32 %v3314_v33, %v4056_v63  ;;  %v1238_v7 = vmul.f32 %v3318_v6, %v3400_v49  ;;  %v729_v4 = vadd.f32 %v697_v42, %v664_v59  ;;  %v4085_v59 = vld [vmem:[#allocation40_spill] sm:$0xff] }
  0xca   : > { %v848_v12 = vadd.f32 %v816_v10, %v783_v60  ;;  %v1172_v28 = vsel %vm339_vm3, %v1112_v11, 0.0  ;;  %v575_v39 = vmul.f32 %v1871_v27, %v3250_v25  ;;  %v608_v16 = vmul.f32 %v3253_v15, %v4045_v47  ;;  %v4087_v11 = vld [vmem:[#allocation64_spill] sm:$0xff] }
  0xcb   : > { %v1359_v62 = vadd.f32 %v1327_v19, %v937_v35  ;;  %v1270_v41 = vadd.f32 %v1238_v7, %v1205_v13  ;;  %v1303_v58 = vmul.f32 %v3322_v37, %v1172_v28  ;;  %v673_v63 = vmul.f32 %v3278_v9, %v4046_v38  ;;  %v4086_v35 = vld [vmem:[#allocation62_spill] sm:$0xff] }
  0xcc   : > { %v913_v23 = vadd.f32 %v881_v8, %v848_v12  ;;  %v759_v22 = vmul.f32 %v3286_v43, %v4009_v14  ;;  %v792_v42 = vmul.f32 %v3295_v2, %v3178_v21  ;;  %v640_v60 = vadd.f32 %v608_v16, %v575_v39 }
  0xcd   : > { %1469 = vmatmul.f32.gmra.mxu2 %v1359_v62  ;;  %v1335_v51 = vadd.f32 %v1303_v58, %v1270_v41  ;;  %v857_v19 = vmul.f32 %v3310_v44, %v3190_v17  ;;  %v1181_v10 = vmul.f32 %v3314_v33, %v4085_v59  ;;  %v1214_v38 = vmul.f32 %v3318_v6, %v4086_v35 }
  0xce   : > { %v945_v47 = vadd.f32 %v913_v23, %v729_v4  ;;  %v824_v8 = vadd.f32 %v792_v42, %v759_v22  ;;  %v1279_v14 = vmul.f32 %v3322_v37, %v4087_v11  ;;  %v705_v13 = vadd.f32 %v673_v63, %v640_v60  ;;  %v4088_v63 = vld [vmem:[#allocation23_spill] sm:$0xff]  ;;  %v4089_v42 = vld [vmem:[#allocation49_spill] sm:$0xff] }
  0xcf   : > { %v583_v7 = vmul.f32 %v3250_v25, %v2579_v24  ;;  %v616_v12 = vmul.f32 %v3253_v15, %v2889_v1  ;;  %v681_v28 = vmul.f32 %v3278_v9, %v2915_v0  ;;  %v1246_v4 = vadd.f32 %v1214_v38, %v1181_v10  ;;  %v3453_v24 = vld [vmem:[%s2204_s21 + $0x78] sm:$0xff] }
  0xd0   : > { %v1367_v27 = vadd.f32 %v1335_v51, %v945_v47  ;;  %v889_v39 = vadd.f32 %v857_v19, %v824_v8  ;;  %v767_v62 = vmul.f32 %v3286_v43, %v3241_v31  ;;  %v800_v58 = vmul.f32 %v3295_v2, %v3216_v36 }
  0xd1   : > { %v648_v41 = vadd.f32 %v616_v12, %v583_v7  ;;  %v865_v16 = vmul.f32 %v3310_v44, %v3226_v5  ;;  %v1189_v1 = vmul.f32 %v3453_v24, %v3314_v33  ;;  %v1311_v23 = vadd.f32 %v1279_v14, %v1246_v4 }
  0xd2   : > { %1493 = vmatmul.f32.gmra.mxu3 %v1367_v27  ;;  %v921_v0 = vadd.f32 %v889_v39, %v705_v13  ;;  %v1222_v22 = vmul.f32 %v3318_v6, %v4088_v63  ;;  %v1287_v51 = vmul.f32 %v3322_v37, %v4089_v42  ;;  %v832_v19 = vadd.f32 %v800_v58, %v767_v62  ;;  %v1873_v27 = vld [vmem:[%s2204_s21 + $0xc0] sm:$0xff]  ;;  %v4090_v39 = vld [vmem:[#allocation25_spill] sm:$0xff] }
  0xd3   : > { %v713_v60 = vadd.f32 %v681_v28, %v648_v41  ;;  %v592_v59 = vmul.f32 %v3250_v25, %v2646_v29  ;;  %v625_v10 = vmul.f32 %v3253_v15, %v2959_v54  ;;  %v690_v38 = vmul.f32 %v3278_v9, %v2953_v18  ;;  %v4091_v18 = vld [vmem:[#allocation30_spill] sm:$0xff] }
  0xd4   : > { %v1343_v47 = vadd.f32 %v1311_v23, %v921_v0  ;;  %v1254_v8 = vadd.f32 %v1222_v22, %v1189_v1  ;;  %v776_v14 = vmul.f32 %v3286_v43, %v3266_v40  ;;  %v897_v13 = vadd.f32 %v865_v16, %v832_v19  ;;  %v4092_v1 = vld [vmem:[#allocation67_spill] sm:$0xff]  ;;  %v4093_v19 = vld [vmem:[#allocation17_spill] sm:$0xff] }
  0xd5   : > { %v657_v7 = vadd.f32 %v625_v10, %v592_v59  ;;  %v809_v12 = vmul.f32 %v3295_v2, %v4053_v50  ;;  %v874_v28 = vmul.f32 %v3310_v44, %v4054_v46  ;;  %v1198_v54 = vmul.f32 %v1873_v27, %v3314_v33  ;;  %v4094_v59 = vld [vmem:[#allocation48_spill] sm:$0xff] }
  0xd6   : > { %1421 = vmatmul.f32.gmra.mxu0 %v1343_v47  ;;  %v1319_v29 = vadd.f32 %v1287_v51, %v1254_v8  ;;  %v1231_v4 = vmul.f32 %v3318_v6, %v4090_v39  ;;  %v1296_v62 = vmul.f32 %v3322_v37, %v4091_v18  ;;  %v929_v40 = vadd.f32 %v897_v13, %v713_v60  ;;  %v4095_v8 = vld [vmem:[#allocation13_spill] sm:$0xff]  ;;  %v4098_v18 = vld [vmem:[#allocation36_spill] sm:$0xff] }
  0xd7   : > { %v722_v41 = vadd.f32 %v690_v38, %v657_v7  ;;  %v841_v58 = vadd.f32 %v809_v12, %v776_v14  ;;  %v600_v50 = vmul.f32 %v3250_v25, %v2713_v45  ;;  %v633_v46 = vmul.f32 %v3253_v15, %v4057_v61 }
  0xd8   : > { %v1263_v16 = vadd.f32 %v1231_v4, %v1198_v54  ;;  %v698_v0 = vmul.f32 %v3278_v9, %v4092_v1  ;;  %v784_v23 = vmul.f32 %v3286_v43, %v3137_v20  ;;  %v1351_v22 = vadd.f32 %v1319_v29, %v929_v40  ;;  %v4096_v29 = vld [vmem:[#allocation56_spill] sm:$0xff]  ;;  %v1874_v40 = vld [vmem:[%s2204_s21 + $0x30] sm:$0xff] }
  0xd9   : > { %v906_v51 = vadd.f32 %v874_v28, %v841_v58  ;;  %v817_v60 = vmul.f32 %v3295_v2, %v4093_v19  ;;  %v882_v10 = vmul.f32 %v3310_v44, %v4094_v59  ;;  %v665_v45 = vadd.f32 %v633_v46, %v600_v50  ;;  %v4099_v46 = vld [vmem:[#allocation45_spill] sm:$0xff] }
  0xda   : > { %v1328_v47 = vadd.f32 %v1296_v62, %v1263_v16  ;;  %v1016_v61 = vsel %vm407_vm1, %v4082_v57, %v4095_v8  ;;  %v3496_v38 = vmul.f32 0.0, %v3314_v33  ;;  %1445 = vmatmul.f32.gmra.mxu1 %v1351_v22  ;;  %v1304_v7 = vmul.f32 %v3322_v37, %v4084_v55  ;;  %v4097_v57 = vld [vmem:[#allocation68_spill] sm:$0xff] }
  0xdb   : > { %v938_v20 = vadd.f32 %v906_v51, %v722_v41  ;;  %v849_v14 = vadd.f32 %v817_v60, %v784_v23  ;;  %v1077_v13 = vsel %vm336_vm0, %v1016_v61, 0.0  ;;  %v730_v12 = vadd.f32 %v698_v0, %v665_v45  ;;  %v1875_v23 = vld [vmem:[%s2204_s21 + $0x40] sm:$0xff]  ;;  %v4101_v60 = vld [vmem:[#allocation46_spill] sm:$0xff] }
  0xdc   : > { %v1239_v28 = vmul.f32 %v3318_v6, %v1077_v13  ;;  %v576_v27 = vmul.f32 %v3250_v25, %v4096_v29  ;;  %v609_v54 = vmul.f32 %v3253_v15, %v4097_v57  ;;  %v674_v62 = vmul.f32 %v3278_v9, %v4098_v18  ;;  %v4100_v51 = vld [vmem:[#allocation43_spill] sm:$0xff]  ;;  %v4104_v57 = vld [vmem:[#allocation18_spill] sm:$0xff] }
  0xdd   : > { %v1360_v39 = vadd.f32 %v1328_v47, %v938_v20  ;;  %v914_v4 = vadd.f32 %v882_v10, %v849_v14  ;;  %v760_v41 = vmul.f32 %v1874_v40, %v3286_v43  ;;  %v793_v16 = vmul.f32 %v3295_v2, %v4065_v48  ;;  %v4102_v14 = vld [vmem:[#allocation37_spill] sm:$0xff]  ;;  %v1876_v18 = vld [vmem:[%s2204_s21 + $0x80] sm:$0xff] }
  0xde   : > { %v1271_v58 = vadd.f32 %v1239_v28, %v3496_v38  ;;  %v641_v50 = vadd.f32 %v609_v54, %v576_v27  ;;  %v858_v1 = vmul.f32 %v3310_v44, %v4099_v46  ;;  %v1182_v22 = vmul.f32 %v1875_v23, %v3314_v33  ;;  %v4105_v54 = vld [vmem:[#allocation20_spill] sm:$0xff]  ;;  %v4108_v46 = vld [vmem:[#allocation58_spill] sm:$0xff] }
  0xdf   : > { %1472 = vmatmul.f32.gmra.mxu2 %v1360_v39  ;;  %v946_v0 = vadd.f32 %v914_v4, %v730_v12  ;;  %v1215_v19 = vmul.f32 %v3318_v6, %v4100_v51  ;;  %v1280_v59 = vmul.f32 %v3322_v37, %v4101_v60  ;;  %v825_v45 = vadd.f32 %v793_v16, %v760_v41  ;;  %v4103_v12 = vld [vmem:[#allocation32_spill] sm:$0xff] }
  0xe0   : > { %v1336_v10 = vadd.f32 %v1304_v7, %v1271_v58  ;;  %v706_v47 = vadd.f32 %v674_v62, %v641_v50  ;;  %v584_v48 = vmul.f32 %v3250_v25, %v2852_v56  ;;  %v617_v20 = vmul.f32 %v3253_v15, %v4070_v52  ;;  %v4106_v52 = vld [vmem:[#allocation19_spill] sm:$0xff]  ;;  %v4107_v50 = vld [vmem:[#allocation21_spill] sm:$0xff] }
  0xe1   : > { %v1247_v61 = vadd.f32 %v1215_v19, %v1182_v22  ;;  %v682_v13 = vmul.f32 %v3278_v9, %v4102_v14  ;;  %v768_v28 = vmul.f32 %v4103_v12, %v3286_v43  ;;  %v890_v27 = vadd.f32 %v858_v1, %v825_v45  ;;  %v4109_v22 = vld [vmem:[#allocation14_spill] sm:$0xff]  ;;  %v4110_v19 = vld [vmem:[#allocation69_spill] sm:$0xff]  ;;  %v4111_v45 = vld [vmem:[#allocation59_spill] sm:$0xff] }
  0xe2   : > { %v1368_v29 = vadd.f32 %v1336_v10, %v946_v0  ;;  %v801_v7 = vmul.f32 %v3295_v2, %v4104_v57  ;;  %v866_v39 = vmul.f32 %v3310_v44, %v4105_v54  ;;  %v649_v56 = vadd.f32 %v617_v20, %v584_v48  ;;  %v4112_v48 = vld [vmem:[#allocation53_spill] sm:$0xff]  ;;  %v1877_v12 = vld [vmem:[%s2204_s21 + $0xc8] sm:$0xff]  ;;  %v4114_v54 = vld [vmem:[#allocation55_spill] sm:$0xff] }
  0xe3   : > { %v1312_v4 = vadd.f32 %v1280_v59, %v1247_v61  ;;  %v1190_v62 = vmul.f32 %v1876_v18, %v3314_v33  ;;  %v1223_v40 = vmul.f32 %v3318_v6, %v4106_v52  ;;  %v922_v41 = vadd.f32 %v890_v27, %v706_v47  ;;  %v4113_v57 = vld [vmem:[#allocation52_spill] sm:$0xff] }
  0xe4   : > { %1496 = vmatmul.f32.gmra.mxu3 %v1368_v29  ;;  %v833_v58 = vadd.f32 %v801_v7, %v768_v28  ;;  %v1288_v16 = vmul.f32 %v3322_v37, %v4107_v50  ;;  %v593_v1 = vmul.f32 %v4108_v46, %v3250_v25  ;;  %v714_v0 = vadd.f32 %v682_v13, %v649_v56  ;;  %v4115_v56 = vld [vmem:[#allocation65_spill] sm:$0xff]  ;;  %v4116_v46 = vld [vmem:[#allocation34_spill] sm:$0xff] }
  0xe5   : > { %v1255_v23 = vadd.f32 %v1223_v40, %v1190_v62  ;;  %v626_v51 = vmul.f32 %v3253_v15, %v4109_v22  ;;  %v691_v60 = vmul.f32 %v3278_v9, %v4110_v19  ;;  %v1344_v59 = vadd.f32 %v1312_v4, %v922_v41 }
  0xe6   : > { %v898_v10 = vadd.f32 %v866_v39, %v833_v58  ;;  %v777_v47 = vmul.f32 %v4111_v45, %v3286_v43  ;;  %v810_v61 = vmul.f32 %v3295_v2, %v4112_v48  ;;  %v875_v13 = vmul.f32 %v3310_v44, %v4081_v30 }
  0xe7   : > { %v1320_v20 = vadd.f32 %v1288_v16, %v1255_v23  ;;  %v658_v14 = vadd.f32 %v626_v51, %v593_v1  ;;  %v1199_v28 = vmul.f32 %v1877_v12, %v3314_v33  ;;  %1424 = vmatmul.f32.gmra.mxu0 %v1344_v59  ;;  %v1232_v7 = vmul.f32 %v3318_v6, %v4113_v57  ;;  %v4117_v59 = vld [vmem:[#allocation35_spill] sm:$0xff]  ;;  %v1881_v57 = vld [vmem:[%s2204_s21 + $0x48] sm:$0xff] }
  0xe8   : > { %v930_v29 = vadd.f32 %v898_v10, %v714_v0  ;;  %v842_v27 = vadd.f32 %v810_v61, %v777_v47  ;;  %v1297_v39 = vmul.f32 %v3322_v37, %v4114_v54  ;;  %v536_v18 = vsel %vm504_vm2, %v4115_v56, %v4084_v55  ;;  %v1878_v0 = vld [vmem:[%s2204_s21 + $0xf8] sm:$0xff]  ;;  %v1879_v61 = vld [vmem:[%s2204_s21 + $0x28] sm:$0xff] }
  0xe9   : > { %v723_v4 = vadd.f32 %v691_v60, %v658_v14  ;;  %v601_v30 = vmul.f32 %v3403_v53, %v3250_v25  ;;  %v634_v62 = vmul.f32 %v3253_v15, %v3144_v34  ;;  %v1264_v41 = vadd.f32 %v1232_v7, %v1199_v28  ;;  %v4118_v7 = vld [vmem:[#allocation61_spill] sm:$0xff] }
  0xea   : > { %v1352_v52 = vadd.f32 %v1320_v20, %v930_v29  ;;  %v907_v40 = vadd.f32 %v875_v13, %v842_v27  ;;  %v568_v58 = vsel %vm339_vm3, %v536_v18, 0.0  ;;  %v749_v1 = vsel %vm504_vm2, %v3284_v32, %v4116_v46  ;;  %v1880_v13 = vld [vmem:[%s2204_s21 + $0x38] sm:$0xff]  ;;  %v1479_v46 = vpop.f32.mrf.mxu3 }
  0xeb   : > { %v666_v50 = vadd.f32 %v634_v62, %v601_v30  ;;  %v699_v16 = vmul.f32 %v3278_v9, %v568_v58  ;;  %v785_v53 = vmul.f32 %v1878_v0, %v3286_v43  ;;  %v1329_v23 = vadd.f32 %v1297_v39, %v1264_v41 }
  0xec   : > { %1448 = vmatmul.f32.gmra.mxu1 %v1352_v52  ;;  %v939_v34 = vadd.f32 %v907_v40, %v723_v4  ;;  %v752_v22 = vsel %vm339_vm3, %v749_v1, 0.0  ;;  %v818_v51 = vmul.f32 %v3295_v2, %v3400_v49  ;;  %v1142_v32 = vsel %vm504_vm2, %v4084_v55, %v4117_v59  ;;  %v4119_v4 = vld [vmem:[#allocation63_spill] sm:$0xff] }
  0xed   : > { %v731_v19 = vadd.f32 %v699_v16, %v666_v50  ;;  %v883_v60 = vmul.f32 %v3310_v44, %v752_v22  ;;  %v1240_v10 = vmul.f32 %v3318_v6, %v4095_v8  ;;  %v1174_v48 = vsel %vm339_vm3, %v1142_v32, 0.0  ;;  %v3617_v52 = vld [vmem:[%s3741_s3] ss:$0 sm:$0xff]  ;;  %v1431_v50 = vpop.f32.mrf.mxu1 }
  0xee   : > { %v1361_v45 = vadd.f32 %v1329_v23, %v939_v34  ;;  %v850_v47 = vadd.f32 %v818_v51, %v785_v53  ;;  %v577_v49 = vmul.f32 %v1879_v61, %v3250_v25  ;;  %v1305_v14 = vmul.f32 %v3322_v37, %v1174_v48  ;;  %v4120_v53 = vld [vmem:[#allocation22_spill] sm:$0xff] }
  0xef   : > { %v1272_v20 = vadd.f32 %v1240_v10, %v3496_v38  ;;  %v610_v3 = vmul.f32 %v3253_v15, %v3178_v21  ;;  %v675_v55 = vmul.f32 %v3278_v9, %v3190_v17  ;;  %v761_v26 = vmul.f32 %v1880_v13, %v3286_v43  ;;  %v1455_v38 = vpop.f32.mrf.mxu2 }
  0xf0   : > { %1475 = vmatmul.f32.gmra.mxu2 %v1361_v45  ;;  %v915_v8 = vadd.f32 %v883_v60, %v850_v47  ;;  %v794_v12 = vmul.f32 %v3295_v2, %v4086_v35  ;;  %v859_v28 = vmul.f32 %v3310_v44, %v4087_v11  ;;  %v1183_v21 = vmul.f32 %v1881_v57, %v3314_v33 }
  0xf1   : > { %v1337_v29 = vadd.f32 %v1305_v14, %v1272_v20  ;;  %v642_v27 = vadd.f32 %v610_v3, %v577_v49  ;;  %v1216_v17 = vmul.f32 %v3318_v6, %v4118_v7  ;;  %v1281_v56 = vmul.f32 %v3322_v37, %v4119_v4 }
  0xf2   : > { %v947_v54 = vadd.f32 %v915_v8, %v731_v19  ;;  %v826_v39 = vadd.f32 %v794_v12, %v761_v26  ;;  %v585_v35 = vmul.f32 %v3250_v25, %v3241_v31  ;;  %v618_v30 = vmul.f32 %v3253_v15, %v3216_v36  ;;  %v1407_v25 = vpop.f32.mrf.mxu0  ;;  %v1882_v15 = vld [vmem:[%s2204_s21 + $0x88] sm:$0xff] }
  0xf3   : > { %v707_v18 = vadd.f32 %v675_v55, %v642_v27  ;;  %v1248_v11 = vadd.f32 %v1216_v17, %v1183_v21  ;;  %v683_v62 = vmul.f32 %v3278_v9, %v3226_v5  ;;  %v769_v58 = vmul.f32 %v3453_v24, %v3286_v43  ;;  %v4121_v24 = vld [vmem:[#allocation50_spill] sm:$0xff] }
  0xf4   : > { %v1369_v40 = vadd.f32 %v1337_v29, %v947_v54  ;;  %v891_v41 = vadd.f32 %v859_v28, %v826_v39  ;;  %v802_v31 = vmul.f32 %v3295_v2, %v4088_v63  ;;  %v650_v36 = vadd.f32 %v618_v30, %v585_v35 }
  0xf5   : > { %v1313_v16 = vadd.f32 %v1281_v56, %v1248_v11  ;;  %v867_v5 = vmul.f32 %v3310_v44, %v4089_v42  ;;  %v1191_v9 = vmul.f32 %v1882_v15, %v3314_v33  ;;  %v1224_v43 = vmul.f32 %v3318_v6, %v4120_v53 }
  0xf6   : > { %1499 = vmatmul.f32.gmra.mxu3 %v1369_v40  ;;  %v923_v1 = vadd.f32 %v891_v41, %v707_v18  ;;  %v834_v0 = vadd.f32 %v802_v31, %v769_v58  ;;  %v1289_v2 = vmul.f32 %v3322_v37, %v4121_v24  ;;  %v715_v63 = vadd.f32 %v683_v62, %v650_v36 }
  0xf7   : > { %v1408_v34 = vadd.f32 %v3617_v52, %v1407_v25  ;;  %v1432_v23 = vadd.f32 %v3617_v52, %v1431_v50  ;;  %v1456_v44 = vadd.f32 %v3617_v52, %v1455_v38  ;;  %v1256_v22 = vadd.f32 %v1224_v43, %v1191_v9  ;;  %v1458_v10 = vpop.f32.mrf.mxu2  ;;  %v1482_v61 = vpop.f32.mrf.mxu3 }
  0xf8   : > { %v1345_v42 = vadd.f32 %v1313_v16, %v923_v1  ;;  %v899_v33 = vadd.f32 %v867_v5, %v834_v0  ;;  %v1480_v51 = vadd.f32 %v3617_v52, %v1479_v46  ;;  %v1459_v45 = vadd.f32 %v3617_v52, %v1458_v10 }
  0xf9   : > { %v1503_v19 = vmax.f32 %v1408_v34, 0.0  ;;  %v1511_v60 = vmax.f32 %v1432_v23, 0.0  ;;  %v1519_v59 = vmax.f32 %v1456_v44, 0.0  ;;  %v1321_v32 = vadd.f32 %v1289_v2, %v1256_v22 }
  0xfa   : > { %1427 = vmatmul.f32.gmra.mxu0 %v1345_v42  ;;  %v931_v6 = vadd.f32 %v899_v33, %v715_v63  ;;  %v1527_v37 = vmax.f32 %v1480_v51, 0.0  ;;  %v1520_v48 = vmax.f32 %v1459_v45, 0.0  ;;  %v1483_v20 = vadd.f32 %v3617_v52, %v1482_v61 }
  0xfb   : > { %1535 = vst [vmem:[%s3637_s24] sm:$0xff] %v1503_v19  ;;  %v1410_v49 = vpop.f32.mrf.mxu0 }
  0xfc   : > { %v1353_v47 = vadd.f32 %v1321_v32, %v931_v6  ;;  %1543 = vst [vmem:[%s3637_s24 + $0x40] sm:$0xff] %v1511_v60  ;;  %v1411_v14 = vadd.f32 %v3617_v52, %v1410_v49  ;;  %v1528_v3 = vmax.f32 %v1483_v20, 0.0 }
  0xfd   : > { %1551 = vst [vmem:[%s3637_s24 + $0x80] sm:$0xff] %v1519_v59 }
  0xfe   : > { %1451 = vmatmul.f32.gmra.mxu1 %v1353_v47  ;;  %1559 = vst [vmem:[%s3637_s24 + $0xc0] sm:$0xff] %v1527_v37  ;;  %v1504_v55 = vmax.f32 %v1411_v14, 0.0 }
  0xff   : > { %1552 = vst [vmem:[%s3637_s24 + $0x88] sm:$0xff] %v1520_v48 }
 0x100   : > { %1560 = vst [vmem:[%s3637_s24 + $0xc8] sm:$0xff] %v1528_v3 }
 0x101   : > { %1536 = vst [vmem:[%s3637_s24 + $0x8] sm:$0xff] %v1504_v55 }
 0x102   : > { %v1434_v8 = vpop.f32.mrf.mxu1 }
 0x103   : > { %v1435_v13 = vadd.f32 %v3617_v52, %v1434_v8 }
 0x105   : > { %v1512_v26 = vmax.f32 %v1435_v13, 0.0 }
 0x107   : > { %1544 = vst [vmem:[%s3637_s24 + $0x48] sm:$0xff] %v1512_v26 }
 0x10e   : > { %v1461_v12 = vpop.f32.mrf.mxu2 }
 0x10f   : > { %v1462_v28 = vadd.f32 %v3617_v52, %v1461_v12 }
 0x111   : > { %v1521_v38 = vmax.f32 %v1462_v28, 0.0 }
 0x113   : > { %1553 = vst [vmem:[%s3637_s24 + $0x90] sm:$0xff] %v1521_v38 }
 0x115   : > { %v1485_v27 = vpop.f32.mrf.mxu3 }
 0x116   : > { %v1413_v29 = vpop.f32.mrf.mxu0  ;;  %v1486_v21 = vadd.f32 %v3617_v52, %v1485_v27 }
 0x117   : > { %v1414_v57 = vadd.f32 %v3617_v52, %v1413_v29 }
 0x118   : > { %v1529_v17 = vmax.f32 %v1486_v21, 0.0 }
 0x119   : > { %v1505_v7 = vmax.f32 %v1414_v57, 0.0 }
 0x11a   : > { %1561 = vst [vmem:[%s3637_s24 + $0xd0] sm:$0xff] %v1529_v17 }
 0x11b   : > { %1537 = vst [vmem:[%s3637_s24 + $0x10] sm:$0xff] %v1505_v7 }
 0x11d   : > { %v1437_v54 = vpop.f32.mrf.mxu1 }
 0x11e   : > { %v1438_v39 = vadd.f32 %v3617_v52, %v1437_v54 }
 0x120   : > { %v1513_v4 = vmax.f32 %v1438_v39, 0.0 }
 0x122   : > { %1545 = vst [vmem:[%s3637_s24 + $0x50] sm:$0xff] %v1513_v4 }
 0x127   : > { %v1464_v56 = vpop.f32.mrf.mxu2 }
 0x128   : > { %v1465_v35 = vadd.f32 %v3617_v52, %v1464_v56 }
 0x12a   : > { %v1522_v18 = vmax.f32 %v1465_v35, 0.0 }
 0x12c   : > { %1554 = vst [vmem:[%s3637_s24 + $0x98] sm:$0xff] %v1522_v18 }
 0x12d   : > { %v1488_v30 = vpop.f32.mrf.mxu3 }
 0x12e   : > { %v1416_v11 = vpop.f32.mrf.mxu0  ;;  %v1489_v40 = vadd.f32 %v3617_v52, %v1488_v30 }
 0x12f   : > { %v1417_v62 = vadd.f32 %v3617_v52, %v1416_v11 }
 0x130   : > { %v1530_v58 = vmax.f32 %v1489_v40, 0.0 }
 0x131   : > { %v1506_v41 = vmax.f32 %v1417_v62, 0.0 }
 0x132   : > { %1562 = vst [vmem:[%s3637_s24 + $0xd8] sm:$0xff] %v1530_v58 }
 0x133   : > { %1538 = vst [vmem:[%s3637_s24 + $0x18] sm:$0xff] %v1506_v41  ;;  %v1440_v31 = vpop.f32.mrf.mxu1 }
 0x134   : > { %v1441_v25 = vadd.f32 %v3617_v52, %v1440_v31 }
 0x136   : > { %v1514_v50 = vmax.f32 %v1441_v25, 0.0 }
 0x138   : > { %1546 = vst [vmem:[%s3637_s24 + $0x58] sm:$0xff] %v1514_v50 }
 0x13d   : > { %v1467_v16 = vpop.f32.mrf.mxu2 }
 0x13e   : > { %v1468_v36 = vadd.f32 %v3617_v52, %v1467_v16 }
 0x140   : > { %v1523_v5 = vmax.f32 %v1468_v36, 0.0 }
 0x141   : > { %v1419_v15 = vpop.f32.mrf.mxu0 }
 0x142   : > { %v1420_v9 = vadd.f32 %v3617_v52, %v1419_v15  ;;  %1555 = vst [vmem:[%s3637_s24 + $0xa0] sm:$0xff] %v1523_v5 }
 0x143   : > { %v1491_v46 = vpop.f32.mrf.mxu3 }
 0x144   : > { %v1492_v1 = vadd.f32 %v3617_v52, %v1491_v46  ;;  %v1507_v0 = vmax.f32 %v1420_v9, 0.0 }
 0x145   : > { %v1443_v53 = vpop.f32.mrf.mxu1 }
 0x146   : > { %v1531_v43 = vmax.f32 %v1492_v1, 0.0  ;;  %1539 = vst [vmem:[%s3637_s24 + $0x20] sm:$0xff] %v1507_v0  ;;  %v1444_v24 = vadd.f32 %v3617_v52, %v1443_v53 }
 0x148   : > { %1563 = vst [vmem:[%s3637_s24 + $0xe0] sm:$0xff] %v1531_v43  ;;  %v1515_v2 = vmax.f32 %v1444_v24, 0.0 }
 0x14a   : > { %1547 = vst [vmem:[%s3637_s24 + $0x60] sm:$0xff] %v1515_v2 }
 0x150   : > { %v1470_v63 = vpop.f32.mrf.mxu2 }
 0x151   : > { %v1471_v34 = vadd.f32 %v3617_v52, %v1470_v63 }
 0x153   : > { %v1422_v23 = vpop.f32.mrf.mxu0  ;;  %v1524_v44 = vmax.f32 %v1471_v34, 0.0 }
 0x154   : > { %v1423_v42 = vadd.f32 %v3617_v52, %v1422_v23 }
 0x155   : > { %1556 = vst [vmem:[%s3637_s24 + $0xa8] sm:$0xff] %v1524_v44  ;;  %v1494_v33 = vpop.f32.mrf.mxu3 }
 0x156   : > { %v1508_v22 = vmax.f32 %v1423_v42, 0.0  ;;  %v1495_v51 = vadd.f32 %v3617_v52, %v1494_v33 }
 0x157   : > { %v1446_v19 = vpop.f32.mrf.mxu1 }
 0x158   : > { %1540 = vst [vmem:[%s3637_s24 + $0x28] sm:$0xff] %v1508_v22  ;;  %v1532_v60 = vmax.f32 %v1495_v51, 0.0  ;;  %v1447_v59 = vadd.f32 %v3617_v52, %v1446_v19 }
 0x15a   : > { %1564 = vst [vmem:[%s3637_s24 + $0xe8] sm:$0xff] %v1532_v60  ;;  %v1516_v6 = vmax.f32 %v1447_v59, 0.0 }
 0x15c   : > { %1548 = vst [vmem:[%s3637_s24 + $0x68] sm:$0xff] %v1516_v6 }
 0x162   : > { %v1473_v32 = vpop.f32.mrf.mxu2 }
 0x163   : > { %v1474_v37 = vadd.f32 %v3617_v52, %v1473_v32 }
 0x164   : > { %v1425_v10 = vpop.f32.mrf.mxu0 }
 0x165   : > { %v1525_v45 = vmax.f32 %v1474_v37, 0.0  ;;  %v1426_v47 = vadd.f32 %v3617_v52, %v1425_v10 }
 0x167   : > { %1557 = vst [vmem:[%s3637_s24 + $0xb0] sm:$0xff] %v1525_v45  ;;  %v1497_v48 = vpop.f32.mrf.mxu3  ;;  %v1509_v61 = vmax.f32 %v1426_v47, 0.0 }
 0x168   : > { %v1498_v49 = vadd.f32 %v3617_v52, %v1497_v48 }
 0x169   : > { %v1449_v20 = vpop.f32.mrf.mxu1  ;;  %1541 = vst [vmem:[%s3637_s24 + $0x30] sm:$0xff] %v1509_v61 }
 0x16a   : > { %v1450_v14 = vadd.f32 %v3617_v52, %v1449_v20  ;;  %v1533_v3 = vmax.f32 %v1498_v49, 0.0 }
 0x16c   : > { %v1517_v55 = vmax.f32 %v1450_v14, 0.0  ;;  %1565 = vst [vmem:[%s3637_s24 + $0xf0] sm:$0xff] %v1533_v3 }
 0x16e   : > { %1549 = vst [vmem:[%s3637_s24 + $0x70] sm:$0xff] %v1517_v55 }
 0x173   : > { %v1476_v8 = vpop.f32.mrf.mxu2 }
 0x174   : > { %v1477_v13 = vadd.f32 %v3617_v52, %v1476_v8 }
 0x176   : > { %v1526_v26 = vmax.f32 %v1477_v13, 0.0 }
 0x177   : > { %v1428_v12 = vpop.f32.mrf.mxu0 }
 0x178   : > { %v1429_v28 = vadd.f32 %v3617_v52, %v1428_v12  ;;  %1558 = vst [vmem:[%s3637_s24 + $0xb8] sm:$0xff] %v1526_v26 }
 0x179   : > { %v1500_v38 = vpop.f32.mrf.mxu3 }
 0x17a   : > { %v1510_v29 = vmax.f32 %v1429_v28, 0.0  ;;  %v1501_v27 = vadd.f32 %v3617_v52, %v1500_v38 }
 0x17b   : > { %v1452_v57 = vpop.f32.mrf.mxu1 }
 0x17c   : > { %1542 = vst [vmem:[%s3637_s24 + $0x38] sm:$0xff] %v1510_v29  ;;  %v1453_v21 = vadd.f32 %v3617_v52, %v1452_v57  ;;  %v1534_v7 = vmax.f32 %v1501_v27, 0.0 }
 0x17e   : > { %v1518_v17 = vmax.f32 %v1453_v21, 0.0  ;;  %1566 = vst [vmem:[%s3637_s24 + $0xf8] sm:$0xff] %v1534_v7 }
 0x180   : > { %1550 = vst [vmem:[%s3637_s24 + $0x78] sm:$0xff] %v1518_v17 }
 0x181   : > { %2000 = shalt.err (!%p1997_p0)
}
 0x182   : > { %s2066_s14 = smov 128   ;;  %s2067_s1 = smov 8  }
 0x183   : > { %1765 = dma.vmem_to_hbm [thread:$0]  (%p2175_p2), %s1582_s5, 4096, %s1584_s6, %s1568_s18, %s2066_s14, %s2066_s14, %s2067_s1  }
 0x184 PF: > { %s1598_s23 = sand.u32 1, %s2039_s15   ;;  %p1779_p4 = pnand %p1691_p10, %p2140_p5 }
 0x185   : > { %s1599_s24 = scalar_lea.sflag [#allocation5], %s1598_s23 }
 0x186   : > { %p1780_p6 = pneg %p1779_p4 }
 0x188   : > { %2034 = dma.done.wait (%p1780_p6), %s1599_s24, 4096  }
 0x189   : > { %2036 = vsyncadd (%p1780_p6), %s1599_s24, 4294963200  ;;  %s21_s20 = sadd.s32 1, %s2059_s20   ;;  %s4122_s15 = smov %s2043_s16 }
 0x18a   : > { %p18_p8 = scmp.ge.s32.totalorder %s21_s20, 4   ;;  %s4123_s16 = smov %s2047_s17 }
 0x18b   : > { %s4124_s17 = smov %s2185_s30  ;;  %s4125_s18 = smov %s2055_s19 }
 0x18c   : > { %s4126_s19 = smov %s4128_s13  ;;  %20 = sbr.rel (!%p18_p8) target bundleno = 9 (0x9), region = 89 }
 0x191   :  { %1605 = vsyncpa [#allocation4], 1 }
 0x192   :  { %1607 = vsyncpa [#allocation4 + $0x1], 1 }
 0x193   :  { %1608 = vsyncpa [#allocation7], 1 }
 0x194   :  { %1609 = vsyncpa [#allocation5], 1 }
 0x195   :  { %1611 = vsyncpa [#allocation5 + $0x1], 1 }

</bundles_post_ra>
